<compile_context>
chip_gen: v5e
topology: v5e:2x2
jax: 0.10.0
libtpu: 0.0.40
codegen_flags: <defaults>
</compile_context>

<pallas_src>
import functools

import jax
import jax.numpy as jnp
from jax.experimental import pallas as pl
from jax.experimental.pallas import tpu as pltpu


# ----------------------------------------------------------------------------
# Helpers
# ----------------------------------------------------------------------------
def _round_up(x, m):
    return (x + m - 1) // m * m


def _mxu_target_rows():
    """128 rows already fill v5e's 128-wide MXU; 256 for v6e/v7x."""
    try:
        kind = jax.devices()[0].device_kind.lower()
        if "v5 lite" in kind or "v5e" in kind or "v4" in kind:
            return 128
    except Exception:
        pass
    return 256


def _choose_bblk(B, S_pad, target_rows=None):
    """Batch-block size: prefer >= 2 batch grid steps (so the 'parallel' axis
    can shard across v7x's two TensorCores) while filling the MXU M dim."""
    if target_rows is None:
        target_rows = _mxu_target_rows()
    divisors = [d for d in range(1, B + 1) if B % d == 0]
    pref = [d for d in divisors if B // d >= 2] or divisors
    for d in pref:
        if d * S_pad >= target_rows:
            return d
    return pref[-1]


def _mlp_chunks(dff, cap=1024):
    """Number of d_ff chunks so the (N, chunk) MLP intermediate stays bounded."""
    if dff <= cap:
        return 1
    chunk = 1
    for c in range(cap, 0, -1):
        if dff % c == 0:
            chunk = c
            break
    return dff // chunk


def _ln(x, g, b, eps=1e-5):
    mu = jnp.mean(x, axis=-1, keepdims=True)
    var = jnp.mean((x - mu) ** 2, axis=-1, keepdims=True)
    return (x - mu) * jax.lax.rsqrt(var + eps) * g + b


# ----------------------------------------------------------------------------
# Kernel: the full CLIP text-encoder stack on one (Bblk, S, D) batch block.
# Grid = (batch_blocks, layers); the layer axis streams stacked weights.
# ----------------------------------------------------------------------------
def clip_stack_kernel(x_ref,
                      ln1g_ref, ln1b_ref,
                      wqkv_ref, bqkv_ref,
                      wo_ref, bo_ref,
                      ln2g_ref, ln2b_ref,
                      w1_ref, b1_ref, w2_ref, b2_ref,
                      fng_ref, fnb_ref,
                      o_ref,
                      *, num_heads, mlp_chunks):
    Bblk, S, D = x_ref.shape
    H = num_heads
    hd = D // H
    N = Bblk * S
    DFF = w1_ref.shape[-1]

    l = pl.program_id(1)
    n_layers = pl.num_programs(1)

    # Seed the residual stream from the embeddings on the first layer step.
    # o_ref's block index is constant along the layer axis, so it stays
    # VMEM-resident and carries the residual across layers (no HBM traffic).
    @pl.when(l == 0)
    def _():
        o_ref[...] = x_ref[...]

    x = o_ref[...].astype(jnp.float32).reshape(N, D)

    # ---- self-attention (pre-LN, causal) ----
    h = _ln(x, ln1g_ref[...], ln1b_ref[...])
    qkv = jnp.dot(h.astype(jnp.bfloat16), wqkv_ref[...],
                  preferred_element_type=jnp.float32) + bqkv_ref[...]
    # 1/sqrt(hd) query scale already folded into wqkv/bqkv at pack time.
    q = qkv[:, :D].reshape(Bblk, S, D)
    k = qkv[:, D:2 * D].reshape(Bblk, S, D)
    v = qkv[:, 2 * D:].reshape(Bblk, S, D)

    row = jax.lax.broadcasted_iota(jnp.int32, (S, S), 0)
    col = jax.lax.broadcasted_iota(jnp.int32, (S, S), 1)
    causal_bias = jnp.where(col > row, jnp.float32(-1e9), jnp.float32(0.0))[None]

    # Per-head attention, batched over the batch-block dim (rank-3 einsums,
    # same pattern as the reference flash kernel).  Contexts are concatenated
    # into a lane-dense (N, D) value -> single full-K output projection.
    ctx_heads = []
    for hh in range(H):
        cs = slice(hh * hd, (hh + 1) * hd)
        qh = q[:, :, cs].astype(jnp.bfloat16)
        kh = k[:, :, cs].astype(jnp.bfloat16)
        vh = v[:, :, cs].astype(jnp.bfloat16)
        s = jnp.einsum('bqd,bkd->bqk', qh, kh,
                       preferred_element_type=jnp.float32) + causal_bias
        s = s - jnp.max(s, axis=-1, keepdims=True)
        p = jnp.exp(s)
        p = p * pl.reciprocal(jnp.sum(p, axis=-1, keepdims=True), approx=True)
        ctx_heads.append(jnp.einsum('bqk,bkd->bqd', p.astype(jnp.bfloat16), vh,
                                    preferred_element_type=jnp.float32))
    ctx = jnp.concatenate(ctx_heads, axis=-1).reshape(N, D)

    attn = jnp.dot(ctx.astype(jnp.bfloat16), wo_ref[...],
                   preferred_element_type=jnp.float32) + bo_ref[...]
    x = x + attn

    # ---- MLP (pre-LN, quick_gelu), tiled over d_ff ----
    h2 = _ln(x, ln2g_ref[...], ln2b_ref[...]).astype(jnp.bfloat16)
    chunk = DFF // mlp_chunks
    mlp = jnp.zeros((N, D), jnp.float32)
    for c in range(mlp_chunks):
        sl = slice(c * chunk, (c + 1) * chunk)
        f1 = jnp.dot(h2, w1_ref[:, sl],
                     preferred_element_type=jnp.float32) + b1_ref[:, sl]
        f1 = f1 * jax.nn.sigmoid(1.702 * f1)          # quick_gelu
        mlp = mlp + jnp.dot(f1.astype(jnp.bfloat16), w2_ref[sl, :],
                            preferred_element_type=jnp.float32)
    x = x + mlp + b2_ref[...]

    # ---- write back the residual; fuse the final LayerNorm on the last layer
    @pl.when(l < n_layers - 1)
    def _():
        o_ref[...] = x.reshape(Bblk, S, D)

    @pl.when(l == n_layers - 1)
    def _():
        o_ref[...] = _ln(x, fng_ref[...], fnb_ref[...]).reshape(Bblk, S, D)


# ----------------------------------------------------------------------------
# Wrappers
# ----------------------------------------------------------------------------
_LAYER_WEIGHT_KEYS = ('ln1_g', 'ln1_b', 'wqkv', 'bqkv', 'wo', 'bo',
                      'ln2_g', 'ln2_b', 'w1', 'b1', 'w2', 'b2')


def clip_text_encoder(x, params, num_heads):
    """Run the whole stacked encoder + final LayerNorm in ONE pallas_call."""
    B, S, D = x.shape
    L = params['wqkv'].shape[0]
    DFF = params['w1'].shape[-1]
    Bblk = _choose_bblk(B, S)

    layer_ws = [params[k] for k in _LAYER_WEIGHT_KEYS]
    fng, fnb = params['final_ln_g'], params['final_ln_b']

    def layer_spec(w):
        # leading (layer) axis squeezed; streamed / prefetched along grid axis l
        return pl.BlockSpec((None,) + w.shape[1:], lambda i, l: (l, 0, 0))

    in_specs = [pl.BlockSpec((Bblk, S, D), lambda i, l: (i, 0, 0))]
    in_specs += [layer_spec(w) for w in layer_ws]
    in_specs += [pl.BlockSpec(fng.shape, lambda i, l: (0, 0)),
                 pl.BlockSpec(fnb.shape, lambda i, l: (0, 0))]

    # VMEM budget: one layer's weights double-buffered (prefetch l+1 during l)
    # + activation blocks + Mosaic scratch headroom; cap at 48 MiB so v7x
    # (64 MiB physical per TensorCore) keeps headroom.
    layer_bytes = sum(int(w.size) * w.dtype.itemsize for w in layer_ws) // L
    act_bytes = Bblk * S * D * 4
    vmem_limit = int(min(max(2 * layer_bytes + 8 * act_bytes + (8 << 20),
                             24 << 20), 48 << 20))

    kern = functools.partial(clip_stack_kernel, num_heads=num_heads,
                             mlp_chunks=_mlp_chunks(DFF))
    return pl.pallas_call(
        kern,
        out_shape=jax.ShapeDtypeStruct((B, S, D), jnp.float32),
        grid=(B // Bblk, L),
        in_specs=in_specs,
        out_specs=pl.BlockSpec((Bblk, S, D), lambda i, l: (i, 0, 0)),
        compiler_params=pltpu.CompilerParams(
            dimension_semantics=("parallel", "arbitrary"),
            vmem_limit_bytes=vmem_limit),
    )(x, *layer_ws, fng, fnb)


def frozen_clip_text_embedder_forward(token_ids, params, num_heads):
    """FrozenCLIPTextEmbedder.forward AFTER tokenization:
       returns last_hidden_state [B, max_length, D]."""
    # TODO(synk): CLIPTokenizer (string -> token ids) is host-side string
    #             processing with no Pallas equivalent; token ids are inputs.
    B, S = token_ids.shape
    tok_emb = params['token_embedding']           # (V, D)
    pos_emb = params['position_embedding']        # (S, D)
    x = (tok_emb[token_ids] + pos_emb[None, :S, :]).astype(jnp.float32)

    # Pad sequence to a sublane-friendly multiple of 8 (77 -> 80 for CLIP-L).
    # Padded keys sit after all real queries (causal mask hides them); padded
    # query rows are sliced off at the end.
    S_pad = _round_up(max(S, 8), 8)
    if S_pad != S:
        x = jnp.pad(x, ((0, 0), (0, S_pad - S), (0, 0)))

    z = clip_text_encoder(x, params, num_heads)
    return z[:, :S, :]


# ----------------------------------------------------------------------------
# Deterministic synthetic parameter init (shapes follow HF CLIP text model)
# ----------------------------------------------------------------------------
def init_params(key, vocab, max_len, d, d_ff, n_layers):
    def nrm(k, shape, scale=0.02):
        return (scale * jax.random.normal(k, shape)).astype(jnp.float32)

    keys = jax.random.split(key, 2 + n_layers)
    params = {
        'token_embedding': nrm(keys[0], (vocab, d)),
        'position_embedding': nrm(keys[1], (max_len, d)),
        'final_ln_g': jnp.ones((1, d), jnp.float32),
        'final_ln_b': jnp.zeros((1, d), jnp.float32),
        'layers': [],
    }
    for li in range(n_layers):
        lk = jax.random.split(keys[2 + li], 6)
        params['layers'].append({
            'ln1_g': jnp.ones((1, d), jnp.float32),
            'ln1_b': jnp.zeros((1, d), jnp.float32),
            'wq': nrm(lk[0], (d, d)), 'bq': jnp.zeros((1, d), jnp.float32),
            'wk': nrm(lk[1], (d, d)), 'bk': jnp.zeros((1, d), jnp.float32),
            'wv': nrm(lk[2], (d, d)), 'bv': jnp.zeros((1, d), jnp.float32),
            'wo': nrm(lk[3], (d, d)), 'bo': jnp.zeros((1, d), jnp.float32),
            'ln2_g': jnp.ones((1, d), jnp.float32),
            'ln2_b': jnp.zeros((1, d), jnp.float32),
            'w1': nrm(lk[4], (d, d_ff)), 'b1': jnp.zeros((1, d_ff), jnp.float32),
            'w2': nrm(lk[5], (d_ff, d)), 'b2': jnp.zeros((1, d), jnp.float32),
        })
    return params


def pack_params(params, num_heads):
    """Stack per-layer weights with a leading layer axis (streamed through the
    layer grid axis), fuse Wq/Wk/Wv -> (D, 3D), fold the 1/sqrt(hd) query
    scale into wq/bq, and cast matmul weights to bf16 (MXU-native, halves
    weight DMA).  LayerNorm params and biases stay f32."""
    d = params['token_embedding'].shape[1]
    scale = (d // num_heads) ** -0.5

    def stack(fn):
        return jnp.stack([fn(p) for p in params['layers']], axis=0)

    return {
        'token_embedding': params['token_embedding'],
        'position_embedding': params['position_embedding'],
        'final_ln_g': params['final_ln_g'],
        'final_ln_b': params['final_ln_b'],
        'ln1_g': stack(lambda p: p['ln1_g']),
        'ln1_b': stack(lambda p: p['ln1_b']),
        'wqkv': stack(lambda p: jnp.concatenate(
            [p['wq'] * scale, p['wk'], p['wv']], axis=1)).astype(jnp.bfloat16),
        'bqkv': stack(lambda p: jnp.concatenate(
            [p['bq'] * scale, p['bk'], p['bv']], axis=1)),
        'wo': stack(lambda p: p['wo']).astype(jnp.bfloat16),
        'bo': stack(lambda p: p['bo']),
        'ln2_g': stack(lambda p: p['ln2_g']),
        'ln2_b': stack(lambda p: p['ln2_b']),
        'w1': stack(lambda p: p['w1']).astype(jnp.bfloat16),
        'b1': stack(lambda p: p['b1']),
        'w2': stack(lambda p: p['w2']).astype(jnp.bfloat16),
        'b2': stack(lambda p: p['b2']),
    }


# ----------------------------------------------------------------------------
if __name__ == "__main__":
    # Small-shape stand-in for openai/clip-vit-large-patch14 text model:
    # batch=2, max_length=8 (real: 77), hidden=32 (real: 768), heads=4,
    # mlp=64, layers=2, vocab=100.
    B, S, D, H, DFF, V, L = 2, 8, 32, 4, 64, 100, 2

    key = jax.random.PRNGKey(0)
    k_ids, k_params = jax.random.split(key)
    token_ids = jax.random.randint(k_ids, (B, S), 0, V, dtype=jnp.int32)
    params = pack_params(init_params(k_params, V, S, D, DFF, L), num_heads=H)

    z = frozen_clip_text_embedder_forward(token_ids, params, num_heads=H)
    z = jax.block_until_ready(z)

    assert z.shape == (B, S, D), z.shape
    assert z.dtype == jnp.float32
    assert bool(jnp.all(jnp.isfinite(z)))
    print("KERNEL_OK")
</pallas_src>

<mosaic_0001>
module attributes {stable_mosaic.version = 11 : i64} {
  func.func @clip_stack_kernel(%arg0: i32, %arg1: i32, %arg2: memref<1x8x32xf32, #tpu.memory_space<vmem>>, %arg3: memref<1x1x32xf32, #tpu.memory_space<vmem>>, %arg4: memref<1x1x32xf32, #tpu.memory_space<vmem>>, %arg5: memref<1x32x96xbf16, #tpu.memory_space<vmem>>, %arg6: memref<1x1x96xf32, #tpu.memory_space<vmem>>, %arg7: memref<1x32x32xbf16, #tpu.memory_space<vmem>>, %arg8: memref<1x1x32xf32, #tpu.memory_space<vmem>>, %arg9: memref<1x1x32xf32, #tpu.memory_space<vmem>>, %arg10: memref<1x1x32xf32, #tpu.memory_space<vmem>>, %arg11: memref<1x32x64xbf16, #tpu.memory_space<vmem>>, %arg12: memref<1x1x64xf32, #tpu.memory_space<vmem>>, %arg13: memref<1x64x32xbf16, #tpu.memory_space<vmem>>, %arg14: memref<1x1x32xf32, #tpu.memory_space<vmem>>, %arg15: memref<1x32xf32, #tpu.memory_space<vmem>>, %arg16: memref<1x32xf32, #tpu.memory_space<vmem>>, %arg17: memref<1x8x32xf32, #tpu.memory_space<vmem>>) attributes {dimension_semantics = [#tpu.dimension_semantics<parallel>, #tpu.dimension_semantics<arbitrary>], iteration_bounds = array<i64: 2, 2>, scalar_prefetch = 0 : i64, scratch_operands = 0 : i64, tpu.core_type = #tpu.core_type<tc>, window_params = [{transform_indices = @transform_0, window_bounds = array<i64: 1, 8, 32>}, {transform_indices = @transform_1, window_bounds = array<i64: 1, 1, 32>}, {transform_indices = @transform_2, window_bounds = array<i64: 1, 1, 32>}, {transform_indices = @transform_3, window_bounds = array<i64: 1, 32, 96>}, {transform_indices = @transform_4, window_bounds = array<i64: 1, 1, 96>}, {transform_indices = @transform_5, window_bounds = array<i64: 1, 32, 32>}, {transform_indices = @transform_6, window_bounds = array<i64: 1, 1, 32>}, {transform_indices = @transform_7, window_bounds = array<i64: 1, 1, 32>}, {transform_indices = @transform_8, window_bounds = array<i64: 1, 1, 32>}, {transform_indices = @transform_9, window_bounds = array<i64: 1, 32, 64>}, {transform_indices = @transform_10, window_bounds = array<i64: 1, 1, 64>}, {transform_indices = @transform_11, window_bounds = array<i64: 1, 64, 32>}, {transform_indices = @transform_12, window_bounds = array<i64: 1, 1, 32>}, {pipeline_mode = #tpu.pipeline_mode<synchronous>, transform_indices = @transform_13, window_bounds = array<i64: 1, 32>}, {pipeline_mode = #tpu.pipeline_mode<synchronous>, transform_indices = @transform_14, window_bounds = array<i64: 1, 32>}, {transform_indices = @transform_15, window_bounds = array<i64: 1, 8, 32>}]} {
    %c0_i32 = arith.constant 0 : i32
    %0 = arith.cmpi eq, %arg1, %c0_i32 : i32
    %1 = arith.extui %0 : i1 to i32
    %c0_i32_0 = arith.constant 0 : i32
    %2 = arith.cmpi ne, %1, %c0_i32_0 : i32
    scf.if %2 {
      %c0_76 = arith.constant 0 : index
      %c0_77 = arith.constant 0 : index
      %c0_78 = arith.constant 0 : index
      %202 = vector.load %arg2[%c0_76, %c0_77, %c0_78] : memref<1x8x32xf32, #tpu.memory_space<vmem>>, vector<1x8x32xf32>
      %c0_79 = arith.constant 0 : index
      %c0_80 = arith.constant 0 : index
      %c0_81 = arith.constant 0 : index
      %203 = vector.load %arg17[%c0_79, %c0_80, %c0_81] : memref<1x8x32xf32, #tpu.memory_space<vmem>>, vector<1x8x32xf32>
      tpu.vector_store %arg17[%c0_79, %c0_80, %c0_81], %202 {strides = array<i32>} : memref<1x8x32xf32, #tpu.memory_space<vmem>>, vector<1x8x32xf32>,
    } else {
    }
    %c0 = arith.constant 0 : index
    %c0_1 = arith.constant 0 : index
    %c0_2 = arith.constant 0 : index
    %3 = vector.load %arg17[%c0, %c0_1, %c0_2] : memref<1x8x32xf32, #tpu.memory_space<vmem>>, vector<1x8x32xf32>
    %4 = vector.shape_cast %3 : vector<1x8x32xf32> to vector<8x32xf32>
    %c0_3 = arith.constant 0 : index
    %c0_4 = arith.constant 0 : index
    %c0_5 = arith.constant 0 : index
    %5 = vector.load %arg3[%c0_3, %c0_4, %c0_5] : memref<1x1x32xf32, #tpu.memory_space<vmem>>, vector<1x1x32xf32>
    %6 = vector.shape_cast %5 : vector<1x1x32xf32> to vector<1x32xf32>
    %c0_6 = arith.constant 0 : index
    %c0_7 = arith.constant 0 : index
    %c0_8 = arith.constant 0 : index
    %7 = vector.load %arg4[%c0_6, %c0_7, %c0_8] : memref<1x1x32xf32, #tpu.memory_space<vmem>>, vector<1x1x32xf32>
    %8 = vector.shape_cast %7 : vector<1x1x32xf32> to vector<1x32xf32>
    %cst = arith.constant dense<0.000000e+00> : vector<8xf32>
    %9 = vector.multi_reduction <add>, %4, %cst [1] : vector<8x32xf32> to vector<8xf32>
    %10 = vector.shape_cast %9 : vector<8xf32> to vector<8x1xf32>
    %cst_9 = arith.constant 3.200000e+01 : f32
    %11 = vector.broadcast %cst_9 : f32 to vector<8x1xf32>
    %12 = arith.divf %10, %11 : vector<8x1xf32>
    %13 = vector.broadcast %12 : vector<8x1xf32> to vector<8x32xf32>
    %14 = arith.subf %4, %13 : vector<8x32xf32>
    %15 = arith.mulf %14, %14 : vector<8x32xf32>
    %cst_10 = arith.constant dense<0.000000e+00> : vector<8xf32>
    %16 = vector.multi_reduction <add>, %15, %cst_10 [1] : vector<8x32xf32> to vector<8xf32>
    %17 = vector.shape_cast %16 : vector<8xf32> to vector<8x1xf32>
    %cst_11 = arith.constant 3.200000e+01 : f32
    %18 = vector.broadcast %cst_11 : f32 to vector<8x1xf32>
    %19 = arith.divf %17, %18 : vector<8x1xf32>
    %20 = vector.broadcast %12 : vector<8x1xf32> to vector<8x32xf32>
    %21 = arith.subf %4, %20 : vector<8x32xf32>
    %cst_12 = arith.constant 9.99999974E-6 : f32
    %22 = vector.broadcast %cst_12 : f32 to vector<8x1xf32>
    %23 = arith.addf %19, %22 : vector<8x1xf32>
    %24 = math.rsqrt %23 : vector<8x1xf32>
    %25 = vector.broadcast %24 : vector<8x1xf32> to vector<8x32xf32>
    %26 = arith.mulf %21, %25 : vector<8x32xf32>
    %27 = vector.broadcast %6 : vector<1x32xf32> to vector<8x32xf32>
    %28 = arith.mulf %26, %27 : vector<8x32xf32>
    %29 = vector.broadcast %8 : vector<1x32xf32> to vector<8x32xf32>
    %30 = arith.addf %28, %29 : vector<8x32xf32>
    %31 = arith.truncf %30 : vector<8x32xf32> to vector<8x32xbf16>
    %c0_13 = arith.constant 0 : index
    %c0_14 = arith.constant 0 : index
    %c0_15 = arith.constant 0 : index
    %32 = vector.load %arg5[%c0_13, %c0_14, %c0_15] : memref<1x32x96xbf16, #tpu.memory_space<vmem>>, vector<1x32x96xbf16>
    %33 = vector.shape_cast %32 : vector<1x32x96xbf16> to vector<32x96xbf16>
    %cst_16 = arith.constant dense<0.000000e+00> : vector<8x96xf32>
    %34 = tpu.matmul %31, %33, %cst_16 {dimension_numbers = #tpu.dot_dimension_numbers<[1], [0], [0], [1], [0, 0, 1, 1], [], []>} : vector<8x32xbf16>, vector<32x96xbf16>, vector<8x96xf32> -> vector<8x96xf32>
    %c0_17 = arith.constant 0 : index
    %c0_18 = arith.constant 0 : index
    %c0_19 = arith.constant 0 : index
    %35 = vector.load %arg6[%c0_17, %c0_18, %c0_19] : memref<1x1x96xf32, #tpu.memory_space<vmem>>, vector<1x1x96xf32>
    %36 = vector.shape_cast %35 : vector<1x1x96xf32> to vector<1x96xf32>
    %37 = vector.broadcast %36 : vector<1x96xf32> to vector<8x96xf32>
    %38 = arith.addf %34, %37 : vector<8x96xf32>
    %39 = vector.extract_strided_slice %38 {offsets = [0, 0], sizes = [8, 32], strides = [1, 1]} : vector<8x96xf32> to vector<8x32xf32>
    %40 = vector.shape_cast %39 : vector<8x32xf32> to vector<1x8x32xf32>
    %41 = vector.extract_strided_slice %38 {offsets = [0, 32], sizes = [8, 32], strides = [1, 1]} : vector<8x96xf32> to vector<8x32xf32>
    %42 = vector.shape_cast %41 : vector<8x32xf32> to vector<1x8x32xf32>
    %43 = vector.extract_strided_slice %38 {offsets = [0, 64], sizes = [8, 32], strides = [1, 1]} : vector<8x96xf32> to vector<8x32xf32>
    %44 = vector.shape_cast %43 : vector<8x32xf32> to vector<1x8x32xf32>
    %45 = tpu.iota {dimensions = array<i32: 0>} : vector<8x8xi32>
    %46 = tpu.iota {dimensions = array<i32: 1>} : vector<8x8xi32>
    %47 = arith.cmpi sgt, %46, %45 : vector<8x8xi32>
    %cst_20 = arith.constant -1.000000e+09 : f32
    %cst_21 = arith.constant 0.000000e+00 : f32
    %48 = vector.broadcast %cst_20 : f32 to vector<8x8xf32>
    %49 = vector.broadcast %cst_21 : f32 to vector<8x8xf32>
    %50 = arith.select %47, %48, %49 : vector<8x8xi1>, vector<8x8xf32>
    %51 = vector.shape_cast %50 : vector<8x8xf32> to vector<1x8x8xf32>
    %52 = vector.extract_strided_slice %40 {offsets = [0, 0, 0], sizes = [1, 8, 8], strides = [1, 1, 1]} : vector<1x8x32xf32> to vector<1x8x8xf32>
    %53 = arith.truncf %52 : vector<1x8x8xf32> to vector<1x8x8xbf16>
    %54 = vector.extract_strided_slice %42 {offsets = [0, 0, 0], sizes = [1, 8, 8], strides = [1, 1, 1]} : vector<1x8x32xf32> to vector<1x8x8xf32>
    %55 = arith.truncf %54 : vector<1x8x8xf32> to vector<1x8x8xbf16>
    %56 = vector.extract_strided_slice %44 {offsets = [0, 0, 0], sizes = [1, 8, 8], strides = [1, 1, 1]} : vector<1x8x32xf32> to vector<1x8x8xf32>
    %57 = arith.truncf %56 : vector<1x8x8xf32> to vector<1x8x8xbf16>
    "tpu.trace_start"() <{level = 10 : i32, message = "bqd,bkd->bqk"}> : () -> ()
    %cst_22 = arith.constant dense<0.000000e+00> : vector<1x8x8xf32>
    %58 = tpu.matmul %53, %55, %cst_22 {dimension_numbers = #tpu.dot_dimension_numbers<[2], [2], [1], [1], [0, 0, 0, 1, 1, 1], [0], [0]>} : vector<1x8x8xbf16>, vector<1x8x8xbf16>, vector<1x8x8xf32> -> vector<1x8x8xf32>
    "tpu.trace_stop"() : () -> ()
    %59 = arith.addf %58, %51 : vector<1x8x8xf32>
    %cst_23 = arith.constant dense<0xFF800000> : vector<1x8xf32>
    %60 = vector.multi_reduction <maximumf>, %59, %cst_23 [2] : vector<1x8x8xf32> to vector<1x8xf32>
    %61 = vector.shape_cast %60 : vector<1x8xf32> to vector<1x8x1xf32>
    %62 = vector.broadcast %61 : vector<1x8x1xf32> to vector<1x8x8xf32>
    %63 = arith.subf %59, %62 : vector<1x8x8xf32>
    %64 = math.exp %63 : vector<1x8x8xf32>
    %cst_24 = arith.constant dense<0.000000e+00> : vector<1x8xf32>
    %65 = vector.multi_reduction <add>, %64, %cst_24 [2] : vector<1x8x8xf32> to vector<1x8xf32>
    %66 = vector.shape_cast %65 : vector<1x8xf32> to vector<1x8x1xf32>
    %67 = tpu.reciprocal %66 {approx = true} : vector<1x8x1xf32> -> vector<1x8x1xf32>
    %68 = vector.broadcast %67 : vector<1x8x1xf32> to vector<1x8x8xf32>
    %69 = arith.mulf %64, %68 : vector<1x8x8xf32>
    %70 = arith.truncf %69 : vector<1x8x8xf32> to vector<1x8x8xbf16>
    "tpu.trace_start"() <{level = 10 : i32, message = "bqk,bkd->bqd"}> : () -> ()
    %cst_25 = arith.constant dense<0.000000e+00> : vector<1x8x8xf32>
    %71 = tpu.matmul %70, %57, %cst_25 {dimension_numbers = #tpu.dot_dimension_numbers<[2], [1], [1], [2], [0, 0, 0, 1, 1, 2], [0], [0]>} : vector<1x8x8xbf16>, vector<1x8x8xbf16>, vector<1x8x8xf32> -> vector<1x8x8xf32>
    "tpu.trace_stop"() : () -> ()
    %72 = vector.extract_strided_slice %40 {offsets = [0, 0, 8], sizes = [1, 8, 8], strides = [1, 1, 1]} : vector<1x8x32xf32> to vector<1x8x8xf32>
    %73 = arith.truncf %72 : vector<1x8x8xf32> to vector<1x8x8xbf16>
    %74 = vector.extract_strided_slice %42 {offsets = [0, 0, 8], sizes = [1, 8, 8], strides = [1, 1, 1]} : vector<1x8x32xf32> to vector<1x8x8xf32>
    %75 = arith.truncf %74 : vector<1x8x8xf32> to vector<1x8x8xbf16>
    %76 = vector.extract_strided_slice %44 {offsets = [0, 0, 8], sizes = [1, 8, 8], strides = [1, 1, 1]} : vector<1x8x32xf32> to vector<1x8x8xf32>
    %77 = arith.truncf %76 : vector<1x8x8xf32> to vector<1x8x8xbf16>
    "tpu.trace_start"() <{level = 10 : i32, message = "bqd,bkd->bqk"}> : () -> ()
    %cst_26 = arith.constant dense<0.000000e+00> : vector<1x8x8xf32>
    %78 = tpu.matmul %73, %75, %cst_26 {dimension_numbers = #tpu.dot_dimension_numbers<[2], [2], [1], [1], [0, 0, 0, 1, 1, 1], [0], [0]>} : vector<1x8x8xbf16>, vector<1x8x8xbf16>, vector<1x8x8xf32> -> vector<1x8x8xf32>
    "tpu.trace_stop"() : () -> ()
    %79 = arith.addf %78, %51 : vector<1x8x8xf32>
    %cst_27 = arith.constant dense<0xFF800000> : vector<1x8xf32>
    %80 = vector.multi_reduction <maximumf>, %79, %cst_27 [2] : vector<1x8x8xf32> to vector<1x8xf32>
    %81 = vector.shape_cast %80 : vector<1x8xf32> to vector<1x8x1xf32>
    %82 = vector.broadcast %81 : vector<1x8x1xf32> to vector<1x8x8xf32>
    %83 = arith.subf %79, %82 : vector<1x8x8xf32>
    %84 = math.exp %83 : vector<1x8x8xf32>
    %cst_28 = arith.constant dense<0.000000e+00> : vector<1x8xf32>
    %85 = vector.multi_reduction <add>, %84, %cst_28 [2] : vector<1x8x8xf32> to vector<1x8xf32>
    %86 = vector.shape_cast %85 : vector<1x8xf32> to vector<1x8x1xf32>
    %87 = tpu.reciprocal %86 {approx = true} : vector<1x8x1xf32> -> vector<1x8x1xf32>
    %88 = vector.broadcast %87 : vector<1x8x1xf32> to vector<1x8x8xf32>
    %89 = arith.mulf %84, %88 : vector<1x8x8xf32>
    %90 = arith.truncf %89 : vector<1x8x8xf32> to vector<1x8x8xbf16>
    "tpu.trace_start"() <{level = 10 : i32, message = "bqk,bkd->bqd"}> : () -> ()
    %cst_29 = arith.constant dense<0.000000e+00> : vector<1x8x8xf32>
    %91 = tpu.matmul %90, %77, %cst_29 {dimension_numbers = #tpu.dot_dimension_numbers<[2], [1], [1], [2], [0, 0, 0, 1, 1, 2], [0], [0]>} : vector<1x8x8xbf16>, vector<1x8x8xbf16>, vector<1x8x8xf32> -> vector<1x8x8xf32>
    "tpu.trace_stop"() : () -> ()
    %92 = vector.extract_strided_slice %40 {offsets = [0, 0, 16], sizes = [1, 8, 8], strides = [1, 1, 1]} : vector<1x8x32xf32> to vector<1x8x8xf32>
    %93 = arith.truncf %92 : vector<1x8x8xf32> to vector<1x8x8xbf16>
    %94 = vector.extract_strided_slice %42 {offsets = [0, 0, 16], sizes = [1, 8, 8], strides = [1, 1, 1]} : vector<1x8x32xf32> to vector<1x8x8xf32>
    %95 = arith.truncf %94 : vector<1x8x8xf32> to vector<1x8x8xbf16>
    %96 = vector.extract_strided_slice %44 {offsets = [0, 0, 16], sizes = [1, 8, 8], strides = [1, 1, 1]} : vector<1x8x32xf32> to vector<1x8x8xf32>
    %97 = arith.truncf %96 : vector<1x8x8xf32> to vector<1x8x8xbf16>
    "tpu.trace_start"() <{level = 10 : i32, message = "bqd,bkd->bqk"}> : () -> ()
    %cst_30 = arith.constant dense<0.000000e+00> : vector<1x8x8xf32>
    %98 = tpu.matmul %93, %95, %cst_30 {dimension_numbers = #tpu.dot_dimension_numbers<[2], [2], [1], [1], [0, 0, 0, 1, 1, 1], [0], [0]>} : vector<1x8x8xbf16>, vector<1x8x8xbf16>, vector<1x8x8xf32> -> vector<1x8x8xf32>
    "tpu.trace_stop"() : () -> ()
    %99 = arith.addf %98, %51 : vector<1x8x8xf32>
    %cst_31 = arith.constant dense<0xFF800000> : vector<1x8xf32>
    %100 = vector.multi_reduction <maximumf>, %99, %cst_31 [2] : vector<1x8x8xf32> to vector<1x8xf32>
    %101 = vector.shape_cast %100 : vector<1x8xf32> to vector<1x8x1xf32>
    %102 = vector.broadcast %101 : vector<1x8x1xf32> to vector<1x8x8xf32>
    %103 = arith.subf %99, %102 : vector<1x8x8xf32>
    %104 = math.exp %103 : vector<1x8x8xf32>
    %cst_32 = arith.constant dense<0.000000e+00> : vector<1x8xf32>
    %105 = vector.multi_reduction <add>, %104, %cst_32 [2] : vector<1x8x8xf32> to vector<1x8xf32>
    %106 = vector.shape_cast %105 : vector<1x8xf32> to vector<1x8x1xf32>
    %107 = tpu.reciprocal %106 {approx = true} : vector<1x8x1xf32> -> vector<1x8x1xf32>
    %108 = vector.broadcast %107 : vector<1x8x1xf32> to vector<1x8x8xf32>
    %109 = arith.mulf %104, %108 : vector<1x8x8xf32>
    %110 = arith.truncf %109 : vector<1x8x8xf32> to vector<1x8x8xbf16>
    "tpu.trace_start"() <{level = 10 : i32, message = "bqk,bkd->bqd"}> : () -> ()
    %cst_33 = arith.constant dense<0.000000e+00> : vector<1x8x8xf32>
    %111 = tpu.matmul %110, %97, %cst_33 {dimension_numbers = #tpu.dot_dimension_numbers<[2], [1], [1], [2], [0, 0, 0, 1, 1, 2], [0], [0]>} : vector<1x8x8xbf16>, vector<1x8x8xbf16>, vector<1x8x8xf32> -> vector<1x8x8xf32>
    "tpu.trace_stop"() : () -> ()
    %112 = vector.extract_strided_slice %40 {offsets = [0, 0, 24], sizes = [1, 8, 8], strides = [1, 1, 1]} : vector<1x8x32xf32> to vector<1x8x8xf32>
    %113 = arith.truncf %112 : vector<1x8x8xf32> to vector<1x8x8xbf16>
    %114 = vector.extract_strided_slice %42 {offsets = [0, 0, 24], sizes = [1, 8, 8], strides = [1, 1, 1]} : vector<1x8x32xf32> to vector<1x8x8xf32>
    %115 = arith.truncf %114 : vector<1x8x8xf32> to vector<1x8x8xbf16>
    %116 = vector.extract_strided_slice %44 {offsets = [0, 0, 24], sizes = [1, 8, 8], strides = [1, 1, 1]} : vector<1x8x32xf32> to vector<1x8x8xf32>
    %117 = arith.truncf %116 : vector<1x8x8xf32> to vector<1x8x8xbf16>
    "tpu.trace_start"() <{level = 10 : i32, message = "bqd,bkd->bqk"}> : () -> ()
    %cst_34 = arith.constant dense<0.000000e+00> : vector<1x8x8xf32>
    %118 = tpu.matmul %113, %115, %cst_34 {dimension_numbers = #tpu.dot_dimension_numbers<[2], [2], [1], [1], [0, 0, 0, 1, 1, 1], [0], [0]>} : vector<1x8x8xbf16>, vector<1x8x8xbf16>, vector<1x8x8xf32> -> vector<1x8x8xf32>
    "tpu.trace_stop"() : () -> ()
    %119 = arith.addf %118, %51 : vector<1x8x8xf32>
    %cst_35 = arith.constant dense<0xFF800000> : vector<1x8xf32>
    %120 = vector.multi_reduction <maximumf>, %119, %cst_35 [2] : vector<1x8x8xf32> to vector<1x8xf32>
    %121 = vector.shape_cast %120 : vector<1x8xf32> to vector<1x8x1xf32>
    %122 = vector.broadcast %121 : vector<1x8x1xf32> to vector<1x8x8xf32>
    %123 = arith.subf %119, %122 : vector<1x8x8xf32>
    %124 = math.exp %123 : vector<1x8x8xf32>
    %cst_36 = arith.constant dense<0.000000e+00> : vector<1x8xf32>
    %125 = vector.multi_reduction <add>, %124, %cst_36 [2] : vector<1x8x8xf32> to vector<1x8xf32>
    %126 = vector.shape_cast %125 : vector<1x8xf32> to vector<1x8x1xf32>
    %127 = tpu.reciprocal %126 {approx = true} : vector<1x8x1xf32> -> vector<1x8x1xf32>
    %128 = vector.broadcast %127 : vector<1x8x1xf32> to vector<1x8x8xf32>
    %129 = arith.mulf %124, %128 : vector<1x8x8xf32>
    %130 = arith.truncf %129 : vector<1x8x8xf32> to vector<1x8x8xbf16>
    "tpu.trace_start"() <{level = 10 : i32, message = "bqk,bkd->bqd"}> : () -> ()
    %cst_37 = arith.constant dense<0.000000e+00> : vector<1x8x8xf32>
    %131 = tpu.matmul %130, %117, %cst_37 {dimension_numbers = #tpu.dot_dimension_numbers<[2], [1], [1], [2], [0, 0, 0, 1, 1, 2], [0], [0]>} : vector<1x8x8xbf16>, vector<1x8x8xbf16>, vector<1x8x8xf32> -> vector<1x8x8xf32>
    "tpu.trace_stop"() : () -> ()
    %132 = tpu.concatenate %71, %91, %111, %131 in 2 : vector<1x8x8xf32>, vector<1x8x8xf32>, vector<1x8x8xf32>, vector<1x8x8xf32> -> vector<1x8x32xf32>
    %133 = vector.shape_cast %132 : vector<1x8x32xf32> to vector<8x32xf32>
    %134 = arith.truncf %133 : vector<8x32xf32> to vector<8x32xbf16>
    %c0_38 = arith.constant 0 : index
    %c0_39 = arith.constant 0 : index
    %c0_40 = arith.constant 0 : index
    %135 = vector.load %arg7[%c0_38, %c0_39, %c0_40] : memref<1x32x32xbf16, #tpu.memory_space<vmem>>, vector<1x32x32xbf16>
    %136 = vector.shape_cast %135 : vector<1x32x32xbf16> to vector<32x32xbf16>
    %cst_41 = arith.constant dense<0.000000e+00> : vector<8x32xf32>
    %137 = tpu.matmul %134, %136, %cst_41 {dimension_numbers = #tpu.dot_dimension_numbers<[1], [0], [0], [1], [0, 0, 1, 1], [], []>} : vector<8x32xbf16>, vector<32x32xbf16>, vector<8x32xf32> -> vector<8x32xf32>
    %c0_42 = arith.constant 0 : index
    %c0_43 = arith.constant 0 : index
    %c0_44 = arith.constant 0 : index
    %138 = vector.load %arg8[%c0_42, %c0_43, %c0_44] : memref<1x1x32xf32, #tpu.memory_space<vmem>>, vector<1x1x32xf32>
    %139 = vector.shape_cast %138 : vector<1x1x32xf32> to vector<1x32xf32>
    %140 = vector.broadcast %139 : vector<1x32xf32> to vector<8x32xf32>
    %141 = arith.addf %137, %140 : vector<8x32xf32>
    %142 = arith.addf %4, %141 : vector<8x32xf32>
    %c0_45 = arith.constant 0 : index
    %c0_46 = arith.constant 0 : index
    %c0_47 = arith.constant 0 : index
    %143 = vector.load %arg9[%c0_45, %c0_46, %c0_47] : memref<1x1x32xf32, #tpu.memory_space<vmem>>, vector<1x1x32xf32>
    %144 = vector.shape_cast %143 : vector<1x1x32xf32> to vector<1x32xf32>
    %c0_48 = arith.constant 0 : index
    %c0_49 = arith.constant 0 : index
    %c0_50 = arith.constant 0 : index
    %145 = vector.load %arg10[%c0_48, %c0_49, %c0_50] : memref<1x1x32xf32, #tpu.memory_space<vmem>>, vector<1x1x32xf32>
    %146 = vector.shape_cast %145 : vector<1x1x32xf32> to vector<1x32xf32>
    %cst_51 = arith.constant dense<0.000000e+00> : vector<8xf32>
    %147 = vector.multi_reduction <add>, %142, %cst_51 [1] : vector<8x32xf32> to vector<8xf32>
    %148 = vector.shape_cast %147 : vector<8xf32> to vector<8x1xf32>
    %cst_52 = arith.constant 3.200000e+01 : f32
    %149 = vector.broadcast %cst_52 : f32 to vector<8x1xf32>
    %150 = arith.divf %148, %149 : vector<8x1xf32>
    %151 = vector.broadcast %150 : vector<8x1xf32> to vector<8x32xf32>
    %152 = arith.subf %142, %151 : vector<8x32xf32>
    %153 = arith.mulf %152, %152 : vector<8x32xf32>
    %cst_53 = arith.constant dense<0.000000e+00> : vector<8xf32>
    %154 = vector.multi_reduction <add>, %153, %cst_53 [1] : vector<8x32xf32> to vector<8xf32>
    %155 = vector.shape_cast %154 : vector<8xf32> to vector<8x1xf32>
    %cst_54 = arith.constant 3.200000e+01 : f32
    %156 = vector.broadcast %cst_54 : f32 to vector<8x1xf32>
    %157 = arith.divf %155, %156 : vector<8x1xf32>
    %158 = vector.broadcast %150 : vector<8x1xf32> to vector<8x32xf32>
    %159 = arith.subf %142, %158 : vector<8x32xf32>
    %cst_55 = arith.constant 9.99999974E-6 : f32
    %160 = vector.broadcast %cst_55 : f32 to vector<8x1xf32>
    %161 = arith.addf %157, %160 : vector<8x1xf32>
    %162 = math.rsqrt %161 : vector<8x1xf32>
    %163 = vector.broadcast %162 : vector<8x1xf32> to vector<8x32xf32>
    %164 = arith.mulf %159, %163 : vector<8x32xf32>
    %165 = vector.broadcast %144 : vector<1x32xf32> to vector<8x32xf32>
    %166 = arith.mulf %164, %165 : vector<8x32xf32>
    %167 = vector.broadcast %146 : vector<1x32xf32> to vector<8x32xf32>
    %168 = arith.addf %166, %167 : vector<8x32xf32>
    %169 = arith.truncf %168 : vector<8x32xf32> to vector<8x32xbf16>
    %cst_56 = arith.constant 0.000000e+00 : f32
    %170 = vector.broadcast %cst_56 : f32 to vector<8x32xf32>
    %c0_57 = arith.constant 0 : index
    %c0_58 = arith.constant 0 : index
    %c0_59 = arith.constant 0 : index
    %171 = vector.load %arg11[%c0_57, %c0_58, %c0_59] : memref<1x32x64xbf16, #tpu.memory_space<vmem>>, vector<1x32x64xbf16>
    %172 = vector.shape_cast %171 : vector<1x32x64xbf16> to vector<32x64xbf16>
    %cst_60 = arith.constant dense<0.000000e+00> : vector<8x64xf32>
    %173 = tpu.matmul %169, %172, %cst_60 {dimension_numbers = #tpu.dot_dimension_numbers<[1], [0], [0], [1], [0, 0, 1, 1], [], []>} : vector<8x32xbf16>, vector<32x64xbf16>, vector<8x64xf32> -> vector<8x64xf32>
    %c0_61 = arith.constant 0 : index
    %c0_62 = arith.constant 0 : index
    %c0_63 = arith.constant 0 : index
    %174 = vector.load %arg12[%c0_61, %c0_62, %c0_63] : memref<1x1x64xf32, #tpu.memory_space<vmem>>, vector<1x1x64xf32>
    %175 = vector.shape_cast %174 : vector<1x1x64xf32> to vector<1x64xf32>
    %176 = vector.broadcast %175 : vector<1x64xf32> to vector<8x64xf32>
    %177 = arith.addf %173, %176 : vector<8x64xf32>
    %cst_64 = arith.constant 1.702000e+00 : f32
    %178 = vector.broadcast %cst_64 : f32 to vector<8x64xf32>
    %179 = arith.mulf %178, %177 : vector<8x64xf32>
    %180 = arith.negf %179 : vector<8x64xf32>
    %181 = math.exp %180 : vector<8x64xf32>
    %cst_65 = arith.constant 1.000000e+00 : f32
    %182 = vector.broadcast %cst_65 : f32 to vector<8x64xf32>
    %183 = arith.addf %182, %181 : vector<8x64xf32>
    %184 = arith.divf %182, %183 : vector<8x64xf32>
    %185 = arith.mulf %177, %184 : vector<8x64xf32>
    %186 = arith.truncf %185 : vector<8x64xf32> to vector<8x64xbf16>
    %c0_66 = arith.constant 0 : index
    %c0_67 = arith.constant 0 : index
    %c0_68 = arith.constant 0 : index
    %187 = vector.load %arg13[%c0_66, %c0_67, %c0_68] : memref<1x64x32xbf16, #tpu.memory_space<vmem>>, vector<1x64x32xbf16>
    %188 = vector.shape_cast %187 : vector<1x64x32xbf16> to vector<64x32xbf16>
    %cst_69 = arith.constant dense<0.000000e+00> : vector<8x32xf32>
    %189 = tpu.matmul %186, %188, %cst_69 {dimension_numbers = #tpu.dot_dimension_numbers<[1], [0], [0], [1], [0, 0, 1, 1], [], []>} : vector<8x64xbf16>, vector<64x32xbf16>, vector<8x32xf32> -> vector<8x32xf32>
    %190 = arith.addf %170, %189 : vector<8x32xf32>
    %191 = arith.addf %142, %190 : vector<8x32xf32>
    %c0_70 = arith.constant 0 : index
    %c0_71 = arith.constant 0 : index
    %c0_72 = arith.constant 0 : index
    %192 = vector.load %arg14[%c0_70, %c0_71, %c0_72] : memref<1x1x32xf32, #tpu.memory_space<vmem>>, vector<1x1x32xf32>
    %193 = vector.shape_cast %192 : vector<1x1x32xf32> to vector<1x32xf32>
    %194 = vector.broadcast %193 : vector<1x32xf32> to vector<8x32xf32>
    %195 = arith.addf %191, %194 : vector<8x32xf32>
    %c1_i32 = arith.constant 1 : i32
    %196 = arith.cmpi slt, %arg1, %c1_i32 : i32
    %197 = arith.extui %196 : i1 to i32
    %c0_i32_73 = arith.constant 0 : i32
    %198 = arith.cmpi ne, %197, %c0_i32_73 : i32
    scf.if %198 {
      %202 = vector.shape_cast %195 : vector<8x32xf32> to vector<1x8x32xf32>
      %c0_76 = arith.constant 0 : index
      %c0_77 = arith.constant 0 : index
      %c0_78 = arith.constant 0 : index
      %203 = vector.load %arg17[%c0_76, %c0_77, %c0_78] : memref<1x8x32xf32, #tpu.memory_space<vmem>>, vector<1x8x32xf32>
      tpu.vector_store %arg17[%c0_76, %c0_77, %c0_78], %202 {strides = array<i32>} : memref<1x8x32xf32, #tpu.memory_space<vmem>>, vector<1x8x32xf32>,
    } else {
    }
    %c1_i32_74 = arith.constant 1 : i32
    %199 = arith.cmpi eq, %arg1, %c1_i32_74 : i32
    %200 = arith.extui %199 : i1 to i32
    %c0_i32_75 = arith.constant 0 : i32
    %201 = arith.cmpi ne, %200, %c0_i32_75 : i32
    scf.if %201 {
      %c0_76 = arith.constant 0 : index
      %c0_77 = arith.constant 0 : index
      %202 = vector.load %arg15[%c0_76, %c0_77] : memref<1x32xf32, #tpu.memory_space<vmem>>, vector<1x32xf32>
      %c0_78 = arith.constant 0 : index
      %c0_79 = arith.constant 0 : index
      %203 = vector.load %arg16[%c0_78, %c0_79] : memref<1x32xf32, #tpu.memory_space<vmem>>, vector<1x32xf32>
      %cst_80 = arith.constant dense<0.000000e+00> : vector<8xf32>
      %204 = vector.multi_reduction <add>, %195, %cst_80 [1] : vector<8x32xf32> to vector<8xf32>
      %205 = vector.shape_cast %204 : vector<8xf32> to vector<8x1xf32>
      %cst_81 = arith.constant 3.200000e+01 : f32
      %206 = vector.broadcast %cst_81 : f32 to vector<8x1xf32>
      %207 = arith.divf %205, %206 : vector<8x1xf32>
      %208 = vector.broadcast %207 : vector<8x1xf32> to vector<8x32xf32>
      %209 = arith.subf %195, %208 : vector<8x32xf32>
      %210 = arith.mulf %209, %209 : vector<8x32xf32>
      %cst_82 = arith.constant dense<0.000000e+00> : vector<8xf32>
      %211 = vector.multi_reduction <add>, %210, %cst_82 [1] : vector<8x32xf32> to vector<8xf32>
      %212 = vector.shape_cast %211 : vector<8xf32> to vector<8x1xf32>
      %cst_83 = arith.constant 3.200000e+01 : f32
      %213 = vector.broadcast %cst_83 : f32 to vector<8x1xf32>
      %214 = arith.divf %212, %213 : vector<8x1xf32>
      %215 = vector.broadcast %207 : vector<8x1xf32> to vector<8x32xf32>
      %216 = arith.subf %195, %215 : vector<8x32xf32>
      %cst_84 = arith.constant 9.99999974E-6 : f32
      %217 = vector.broadcast %cst_84 : f32 to vector<8x1xf32>
      %218 = arith.addf %214, %217 : vector<8x1xf32>
      %219 = math.rsqrt %218 : vector<8x1xf32>
      %220 = vector.broadcast %219 : vector<8x1xf32> to vector<8x32xf32>
      %221 = arith.mulf %216, %220 : vector<8x32xf32>
      %222 = vector.broadcast %202 : vector<1x32xf32> to vector<8x32xf32>
      %223 = arith.mulf %221, %222 : vector<8x32xf32>
      %224 = vector.broadcast %203 : vector<1x32xf32> to vector<8x32xf32>
      %225 = arith.addf %223, %224 : vector<8x32xf32>
      %226 = vector.shape_cast %225 : vector<8x32xf32> to vector<1x8x32xf32>
      %c0_85 = arith.constant 0 : index
      %c0_86 = arith.constant 0 : index
      %c0_87 = arith.constant 0 : index
      %227 = vector.load %arg17[%c0_85, %c0_86, %c0_87] : memref<1x8x32xf32, #tpu.memory_space<vmem>>, vector<1x8x32xf32>
      tpu.vector_store %arg17[%c0_85, %c0_86, %c0_87], %226 {strides = array<i32>} : memref<1x8x32xf32, #tpu.memory_space<vmem>>, vector<1x8x32xf32>,
    } else {
    }
    return
  }
  func.func @transform_0(%arg0: i32, %arg1: i32) -> (i32, i32, i32) {
    %c0_i32 = arith.constant 0 : i32
    %c0_i32_0 = arith.constant 0 : i32
    %c0_i32_1 = arith.constant 0 : i32
    return %arg0, %c0_i32, %c0_i32_0 : i32, i32, i32
  }
  func.func @transform_1(%arg0: i32, %arg1: i32) -> (i32, i32, i32) {
    %c0_i32 = arith.constant 0 : i32
    %c0_i32_0 = arith.constant 0 : i32
    %c0_i32_1 = arith.constant 0 : i32
    return %arg1, %c0_i32, %c0_i32_0 : i32, i32, i32
  }
  func.func @transform_2(%arg0: i32, %arg1: i32) -> (i32, i32, i32) {
    %c0_i32 = arith.constant 0 : i32
    %c0_i32_0 = arith.constant 0 : i32
    %c0_i32_1 = arith.constant 0 : i32
    return %arg1, %c0_i32, %c0_i32_0 : i32, i32, i32
  }
  func.func @transform_3(%arg0: i32, %arg1: i32) -> (i32, i32, i32) {
    %c0_i32 = arith.constant 0 : i32
    %c0_i32_0 = arith.constant 0 : i32
    %c0_i32_1 = arith.constant 0 : i32
    return %arg1, %c0_i32, %c0_i32_0 : i32, i32, i32
  }
  func.func @transform_4(%arg0: i32, %arg1: i32) -> (i32, i32, i32) {
    %c0_i32 = arith.constant 0 : i32
    %c0_i32_0 = arith.constant 0 : i32
    %c0_i32_1 = arith.constant 0 : i32
    return %arg1, %c0_i32, %c0_i32_0 : i32, i32, i32
  }
  func.func @transform_5(%arg0: i32, %arg1: i32) -> (i32, i32, i32) {
    %c0_i32 = arith.constant 0 : i32
    %c0_i32_0 = arith.constant 0 : i32
    %c0_i32_1 = arith.constant 0 : i32
    return %arg1, %c0_i32, %c0_i32_0 : i32, i32, i32
  }
  func.func @transform_6(%arg0: i32, %arg1: i32) -> (i32, i32, i32) {
    %c0_i32 = arith.constant 0 : i32
    %c0_i32_0 = arith.constant 0 : i32
    %c0_i32_1 = arith.constant 0 : i32
    return %arg1, %c0_i32, %c0_i32_0 : i32, i32, i32
  }
  func.func @transform_7(%arg0: i32, %arg1: i32) -> (i32, i32, i32) {
    %c0_i32 = arith.constant 0 : i32
    %c0_i32_0 = arith.constant 0 : i32
    %c0_i32_1 = arith.constant 0 : i32
    return %arg1, %c0_i32, %c0_i32_0 : i32, i32, i32
  }
  func.func @transform_8(%arg0: i32, %arg1: i32) -> (i32, i32, i32) {
    %c0_i32 = arith.constant 0 : i32
    %c0_i32_0 = arith.constant 0 : i32
    %c0_i32_1 = arith.constant 0 : i32
    return %arg1, %c0_i32, %c0_i32_0 : i32, i32, i32
  }
  func.func @transform_9(%arg0: i32, %arg1: i32) -> (i32, i32, i32) {
    %c0_i32 = arith.constant 0 : i32
    %c0_i32_0 = arith.constant 0 : i32
    %c0_i32_1 = arith.constant 0 : i32
    return %arg1, %c0_i32, %c0_i32_0 : i32, i32, i32
  }
  func.func @transform_10(%arg0: i32, %arg1: i32) -> (i32, i32, i32) {
    %c0_i32 = arith.constant 0 : i32
    %c0_i32_0 = arith.constant 0 : i32
    %c0_i32_1 = arith.constant 0 : i32
    return %arg1, %c0_i32, %c0_i32_0 : i32, i32, i32
  }
  func.func @transform_11(%arg0: i32, %arg1: i32) -> (i32, i32, i32) {
    %c0_i32 = arith.constant 0 : i32
    %c0_i32_0 = arith.constant 0 : i32
    %c0_i32_1 = arith.constant 0 : i32
    return %arg1, %c0_i32, %c0_i32_0 : i32, i32, i32
  }
  func.func @transform_12(%arg0: i32, %arg1: i32) -> (i32, i32, i32) {
    %c0_i32 = arith.constant 0 : i32
    %c0_i32_0 = arith.constant 0 : i32
    %c0_i32_1 = arith.constant 0 : i32
    return %arg1, %c0_i32, %c0_i32_0 : i32, i32, i32
  }
  func.func @transform_13(%arg0: i32, %arg1: i32) -> (i32, i32) {
    %c0_i32 = arith.constant 0 : i32
    %c0_i32_0 = arith.constant 0 : i32
    %c0_i32_1 = arith.constant 0 : i32
    return %c0_i32, %c0_i32_0 : i32, i32
  }
  func.func @transform_14(%arg0: i32, %arg1: i32) -> (i32, i32) {
    %c0_i32 = arith.constant 0 : i32
    %c0_i32_0 = arith.constant 0 : i32
    %c0_i32_1 = arith.constant 0 : i32
    return %c0_i32, %c0_i32_0 : i32, i32
  }
  func.func @transform_15(%arg0: i32, %arg1: i32) -> (i32, i32, i32) {
    %c0_i32 = arith.constant 0 : i32
    %c0_i32_0 = arith.constant 0 : i32
    %c0_i32_1 = arith.constant 0 : i32
    return %arg0, %c0_i32, %c0_i32_0 : i32, i32, i32
  }
}

</mosaic_0001>

<bundles_post_ra>
// kernel: tpu_custom_call.1
= control target key start
LH: loop header
LB: loop body
LE: loop exit
PB: predicated region body
PF: predicated region fallthrough
CT: control target
= control target key end

     0   :  { %s2620_s0 = inlined_call_operand.hbm [shape: f32[2,8,32], index: 0, kind: input, shape index: {}]   ;;  %s2621_s1 = inlined_call_operand.hbm [shape: f32[2,1,32], index: 1, kind: input, shape index: {}]   ;;  %s2622_s2 = inlined_call_operand.hbm [shape: f32[2,1,32], index: 2, kind: input, shape index: {}]   ;;  %s2623_s3 = inlined_call_operand.vmem [shape: bf16[2,32,96], index: 3, kind: input, shape index: {}]   ;;  %s2624_s4 = inlined_call_operand.vmem [shape: f32[2,1,96], index: 4, kind: input, shape index: {}]   ;;  %s2625_s5 = inlined_call_operand.vmem [shape: bf16[2,32,32], index: 5, kind: input, shape index: {}]   ;;  %s2626_s6 = inlined_call_operand.vmem [shape: f32[2,1,32], index: 6, kind: input, shape index: {}]   ;;  %s2627_s7 = inlined_call_operand.hbm [shape: f32[2,1,32], index: 7, kind: input, shape index: {}]   ;;  %s2628_s8 = inlined_call_operand.vmem [shape: f32[2,1,32], index: 8, kind: input, shape index: {}]   ;;  %s2629_s9 = inlined_call_operand.vmem [shape: bf16[2,32,64], index: 9, kind: input, shape index: {}]   ;;  %s2630_s10 = inlined_call_operand.vmem [shape: f32[2,1,64], index: 10, kind: input, shape index: {}]   ;;  %s2631_s11 = inlined_call_operand.vmem [shape: bf16[2,64,32], index: 11, kind: input, shape index: {}]   ;;  %s2632_s12 = inlined_call_operand.vmem [shape: f32[2,1,32], index: 12, kind: input, shape index: {}]   ;;  %s2633_s13 = inlined_call_operand.vmem [shape: f32[1,32], index: 13, kind: input, shape index: {}]   ;;  %s2634_s14 = inlined_call_operand.vmem [shape: f32[1,32], index: 14, kind: input, shape index: {}]   ;;  %s2635_s15 = inlined_call_operand.hbm [shape: f32[2,8,32], index: 15, kind: output, shape index: {}]  }
   0x1   :  { %2650 = sst [smem:[#allocation29_spill]] %s2620_s0 }
   0x2   :  { %2651 = sst [smem:[#allocation30_spill]] %s2621_s1 }
   0x3   :  { %2652 = sst [smem:[#allocation31_spill]] %s2622_s2 }
   0x4   :  { %2653 = sst [smem:[#allocation32_spill]] %s2623_s3 }
   0x5   :  { %2654 = sst [smem:[#allocation33_spill]] %s2625_s5 }
   0x6   :  { %2655 = sst [smem:[#allocation34_spill]] %s2626_s6 }
   0x7   :  { %2656 = sst [smem:[#allocation35_spill]] %s2627_s7 }
   0x8   :  { %2657 = sst [smem:[#allocation36_spill]] %s2628_s8 }
   0x9   :  { %2658 = sst [smem:[#allocation37_spill]] %s2629_s9 }
   0xa   :  { %2659 = sst [smem:[#allocation38_spill]] %s2630_s10 }
   0xb   :  { %2660 = sst [smem:[#allocation39_spill]] %s2631_s11 }
   0xc   :  { %2661 = sst [smem:[#allocation40_spill]] %s2632_s12 }
   0xd   :  { %2662 = sst [smem:[#allocation41_spill]] %s2633_s13 }
   0xe   :  { %2663 = sst [smem:[#allocation42_spill]] %s2634_s14 }
   0xf   :  { %2664 = sst [smem:[#allocation43_spill]] %s2635_s15 }
  0x10   :  { %20 = vsyncpa [#allocation3], 0 }
  0x11   :  { %22 = vsyncpa [#allocation3 + $0x1], 0 }
  0x12   :  { %23 = vsyncpa [#allocation6], 0 }
  0x13   :  { %25 = vsyncpa [#allocation6 + $0x1], 0 }
  0x14   :  { %26 = vsyncpa [#allocation9], 0 }
  0x15   :  { %28 = vsyncpa [#allocation9 + $0x1], 0 }
  0x16   :  { %29 = vsyncpa [#allocation4], 0 }
  0x17   :  { %31 = vsyncpa [#allocation4 + $0x1], 0  ;;  %s2193_s18 = smov 0   ;;  %s2195_s19 = smov 0  }
  0x18   :  { %s2197_s20 = smov 0   ;;  %s2199_s21 = smov 0  }
  0x19   :  { %s2201_s22 = smov 0   ;;  %s2203_s23 = smov 0  }
  0x1a   :  { %s2205_s24 = smov 0   ;;  %s2207_s25 = smov 0  }
  0x1b   :  { %s2209_s26 = smov 0   ;;  %s2211_s27 = smov 0  }
  0x1c   :  { %s2213_s28 = smov 0  }
  0x1d LB: > { %2665 = sst [smem:[#allocation15_spill]] %s2059_s19  ;;  %s2247_s29 = sadd.s32 4294967295, %s2095_s28   ;;  %s2095_s28 = sphi %s2213_s28, %s37_s28   ;;  %s2091_s27 = sphi %s2211_s27, %s2726_s27   ;;  %s2087_s26 = sphi %s2209_s26, %s2725_s26   ;;  %s2083_s25 = sphi %s2207_s25, %s2724_s25   ;;  %s2079_s24 = sphi %s2205_s24, %s2723_s24   ;;  %s2075_s23 = sphi %s2203_s23, %s2722_s23   ;;  %s2071_s22 = sphi %s2201_s22, %s2721_s22   ;;  %s2067_s21 = sphi %s2199_s21, %s2720_s21   ;;  %s2063_s20 = sphi %s2197_s20, %s2719_s20   ;;  %s2059_s19 = sphi %s2195_s19, %s2718_s19   ;;  %s2055_s18 = sphi %s2193_s18, %s2717_s18  }
  0x1e   : > { %2666 = sst [smem:[#allocation16_spill]] %s2063_s20  ;;  %s46_s30 = sadd.s32 1, %s2087_s26 }
  0x1f   : > { %2667 = sst [smem:[#allocation17_spill]] %s2067_s21  ;;  %p2250_p0 = scmp.ge.s32.totalorder %s46_s30, 2 }
  0x20   : > { %2668 = sst [smem:[#allocation18_spill]] %s2071_s22  ;;  %p64_p1 = scmp.eq.s32.totalorder %s2095_s28, 0 }
  0x21   : > { %2669 = sst [smem:[#allocation19_spill]] %s2075_s23  ;;  %p70_p2 = scmp.eq.s32.totalorder %s2247_s29, 0 }
  0x22   : > { %2670 = sst [smem:[#allocation20_spill]] %s2083_s25  ;;  %s82_s17 = sadd.s32 1, %s2063_s20 }
  0x23   : > { %2671 = sst [smem:[#allocation21_spill]] %s2087_s26  ;;  %s2728_s30 = smov (%p2250_p0, %s46_s30), 0 }
  0x24   : > { %2672 = sst [smem:[#allocation22_spill]] %s2091_s27  ;;  %p89_p3 = scmp.ne.s32.totalorder %s2063_s20, %s2059_s19 }
  0x25   : > { %2674 = sst [smem:[#allocation23_spill]] %s2728_s30  ;;  %p95_p4 = scmp.ne.s32.totalorder %s2059_s19, %s2055_s18 }
  0x26   : > { %s79_s15 = ssub.s32 %s2087_s26, %s2728_s30  ;;  %p91_p6 = por %p89_p3, %p64_p1 }
  0x27   : > { %p80_p5 = scmp.eq.s32.totalorder %s79_s15, 0  ;;  %p2270_p7 = por %p95_p4, %p70_p2 }
  0x28   : > { %p1701_p8 = scmp.lt.s32.totalorder %s2095_s28, 4  ;;  %s498_s13 = sand.u32 1, %s2095_s28  }
  0x29   : > { %s2276_s14 = scalar_select %p80_p5, %s2063_s20, %s82_s17  }
  0x2a   : > { %s2280_s18 = sand.u32 1, %s2063_s20   ;;  %s2677_s1 = sld [smem:[#allocation30_spill]] }
  0x2b   : > { %2676 = sst [smem:[#allocation24_spill]] %s2276_s14  ;;  %s501_s12 = scalar_lea.vmem [#allocation5], %s2280_s18 }
  0x2c   : > { %s508_s10 = sshll.u32 %s501_s12, 4  ;;  %p2289_p9 = pnand %p1701_p8, %p91_p6  ;;  %s509_s10 = int_to_ptr.vmem [resolvable:$true] %s508_s10 }
  0x2d   : > { %p1589_p10 = scmp.ge.s32.totalorder %s2095_s28, 1  ;;  %p609_p11 = scmp.lt.s32.totalorder %s2095_s28, 5 }
  0x2e   : > { %s2295_s11 = scalar_lea.sflag [#allocation6], %s498_s13  ;;  %s1584_s30 = sadd.s32 4294967294, %s2095_s28  }
  0x2f   : > { %p2300_p12 = pnand %p1589_p10, %p609_p11  ;;  %p63_p13 = scmp.ne.s32.totalorder %s2075_s23, %s2071_s22 }
  0x30   : > { %s504_s15 = scalar_lea.hbm %s2677_s1, %s2087_s26  ;;  %s56_s1 = sadd.s32 1, %s2075_s23 }
  0x31   : > { %s506_s17 = sshll.u32 %s504_s15, 4  ;;  %s49_s15 = sadd.s32 1, %s2091_s27  ;;  %s507_s17 = int_to_ptr.hbm [resolvable:$true] %s506_s17 }
  0x32   : > { %1690 = dma.hbm_to_vmem [thread:$0]  (!%p2289_p9), %s507_s17, 16, %s509_s10, %s2295_s11  }
  0x33   : > { %s2730_s15 = smov (!%p2250_p0, %s49_s15), %s2091_s27  ;;  %p69_p4 = scmp.ne.s32.totalorder %s2071_s22, %s2067_s21 }
  0x34   : > { %p51_p3 = scmp.ge.s32.totalorder %s2730_s15, 2  ;;  %p2316_p5 = por %p64_p1, %p63_p13 }
  0x35   : > { %p447_p6 = scmp.eq.s32.totalorder %s2247_s29, 3  ;;  %p2325_p10 = por %p70_p2, %p69_p4 }
  0x36   : > { %s2732_s15 = smov (%p51_p3, %s2730_s15), 0  ;;  %p453_p1 = scmp.eq.s32.totalorder %s1584_s30, 3 }
  0x37   : > { %2681 = sst [smem:[#allocation25_spill]] %s2732_s15  ;;  %p2329_p0 = por %p447_p6, %p63_p13 }
  0x38   : > { %s53_s17 = ssub.s32 %s2091_s27, %s2732_s15  ;;  %s479_s20 = sand.u32 1, %s2075_s23  }
  0x39   : > { %s2683_s16 = scalar_select %p2329_p0, 1, 0 }
  0x3a   : > { %p54_p11 = scmp.eq.s32.totalorder %s53_s17, 0  ;;  %p2336_p3 = por %p453_p1, %p69_p4 }
  0x3b   : > { %2684 = sst [smem:[#allocation26_spill]] %s2683_s16  ;;  %s1587_s8 = sshll.u32 %s479_s20, 3 }
  0x3c   : > { %s2685_s21 = scalar_select %p2336_p3, 1, 0 }
  0x3d   : > { %s2341_s9 = scalar_select %p54_p11, %s2075_s23, %s56_s1  }
  0x3e   : > { %2686 = sst [smem:[#allocation27_spill]] %s2685_s21  ;;  %s1588_s6 = sshll.u32 %s2091_s27, 3 }
  0x3f   : > { %2687 = sst [smem:[#allocation28_spill]] %s2341_s9  ;;  %s483_s30 = scalar_lea.vmem [#allocation2], %s1587_s8 }
  0x40   : > { %s2688_s0 = sld [smem:[#allocation29_spill]]  ;;  %s491_s17 = sshll.u32 %s483_s30, 4  ;;  %s492_s17 = int_to_ptr.vmem [resolvable:$true] %s491_s17 }
  0x41   : > { %p1685_p2 = pnand %p1701_p8, %p2316_p5  ;;  %s2689_s2 = sld [smem:[#allocation31_spill]] }
  0x42   : > { %s518_s3 = scalar_lea.vmem [#allocation7], %s2280_s18  ;;  %s2690_s7 = sld [smem:[#allocation35_spill]] }
  0x43   : > { %s525_s5 = sshll.u32 %s518_s3, 4  ;;  %s563_s30 = scalar_lea.vmem [#allocation8], %s2280_s18  ;;  %s526_s5 = int_to_ptr.vmem [resolvable:$true] %s525_s5 }
  0x44   : > { %s561_s9 = scalar_lea.sflag [#allocation9], %s2280_s18 }
  0x46   : > { %s487_s16 = scalar_lea.hbm %s2688_s0, %s1588_s6  ;;  %s480_s6 = scalar_lea.sflag [#allocation3], %s479_s20 }
  0x47   : > { %s489_s15 = sshll.u32 %s487_s16, 4  ;;  %s521_s27 = scalar_lea.hbm %s2689_s2, %s2087_s26  ;;  %s490_s15 = int_to_ptr.hbm [resolvable:$true] %s489_s15 }
  0x48   : > { %s523_s23 = sshll.u32 %s521_s27, 4  ;;  %s566_s13 = scalar_lea.hbm %s2690_s7, %s2087_s26  ;;  %s524_s23 = int_to_ptr.hbm [resolvable:$true] %s523_s23 }
  0x49   : > { %1687 = dma.hbm_to_vmem [thread:$0]  (!%p1685_p2), %s490_s15, 128, %s492_s17, %s480_s6  }
  0x4a   : > { %1693 = dma.hbm_to_vmem [thread:$0]  (!%p2289_p9), %s524_s23, 16, %s526_s5, %s2295_s11  }
  0x4b   : > { %s570_s0 = sshll.u32 %s563_s30, 4  ;;  %s568_s21 = sshll.u32 %s566_s13, 4  ;;  %s571_s0 = int_to_ptr.vmem [resolvable:$true] %s570_s0  ;;  %s569_s21 = int_to_ptr.hbm [resolvable:$true] %s568_s21 }
  0x4c   : > { %1696 = dma.hbm_to_vmem [thread:$0]  (!%p2289_p9), %s569_s21, 16, %s571_s0, %s561_s9  }
  0x4d   : > { %613 = sbr.rel (%p2300_p12) target bundleno = 2307 (0x903), region = 80  ;;  %s2370_s20 = sand.u32 (!%p2300_p12), 1, %s2071_s22  }
  0x4e   : > { %s2646_s23 = sshll.u32 (!%p2300_p12), %s2370_s20, 3  ;;  %s616_s27 = scalar_lea.sflag (!%p2300_p12), [#allocation3], %s2370_s20 }
  0x4f   : > { %s619_s11 = scalar_lea.vmem (!%p2300_p12), [#allocation2], %s2646_s23 }
  0x52   : > { %2038 = dma.done.wait (%p2325_p10), %s616_s27, 128  }
  0x53   : > { %2040 = vsyncadd (%p2325_p10), %s616_s27, 4294967168  ;;  %s625_s0 = sand.u32 1, %s2247_s29   ;;  %s2382_s14 = sand.u32 1, %s2059_s19  }
  0x54   : > { %s626_s21 = scalar_lea.sflag [#allocation6], %s625_s0 }
  0x55   : > { %2042 = dma.done.wait (%p2270_p7), %s626_s21, 32  }
  0x56   : > { %2044 = vsyncadd (%p2270_p7), %s626_s21, 4294967264  ;;  %s644_s15 = scalar_lea.sflag [#allocation9], %s2382_s14 }
  0x57   : > { %2046 = dma.done.wait (%p2270_p7), %s644_s15, 16  }
  0x58   : > { %2048 = vsyncadd (%p2270_p7), %s644_s15, 4294967280  ;;  %p741_p8 = scmp.lt.s32.totalorder %s2079_s24, 1  ;;  %s2691_s8 = sld [smem:[#allocation32_spill]] }
  0x59   : > { %s2692_s9 = sld [smem:[#allocation33_spill]]  ;;  %p1600_p7 = scmp.ne.s32.totalorder %s2079_s24, 0 }
  0x5a   : > { %s2398_s29 = scalar_select %p741_p8, %s2079_s24, 1 }
  0x5b   : > { %s2694_s23 = sld [smem:[#allocation36_spill]] }
  0x5c   : > { %s1660_s17 = sshll.u32 %s2398_s29, 4  ;;  %s2695_s5 = sld [smem:[#allocation37_spill]] }
  0x5d   : > { %s1663_s13 = sshll.u32 %s2398_s29, 5  ;;  %s2697_s22 = sld [smem:[#allocation40_spill]] }
  0x5e   : > { %s2408_s16 = scalar_lea.vmem %s2691_s8, %s1660_s17  ;;  %s2696_s8 = sld [smem:[#allocation38_spill]] }
  0x5f   : > { %s2413_s27 = scalar_lea.vmem %s2692_s9, %s1660_s17  ;;  %s2698_s15 = sld [smem:[#allocation39_spill]] }
  0x61   : > { %s759_s2 = scalar_lea.vmem %s2694_s23, %s2398_s29  ;;  %s2699_s23 = sshll.u32 %s2370_s20, 3 }
  0x62   : > { %s2426_s7 = scalar_lea.vmem %s2695_s5, %s1660_s17  ;;  %s2444_s18 = scalar_lea.vmem [#allocation10], %s2699_s23 }
  0x63   : > { %s775_s19 = scalar_lea.vmem %s2697_s22, %s2398_s29  ;;  %780 = sbr.rel (%p1600_p7) target bundleno = 106 (0x6a), region = 100 }
  0x64   : > { %s767_s26 = scalar_lea.vmem %s2696_s8, %s2398_s29 }
  0x65   : > { %s2440_s10 = scalar_lea.vmem %s2698_s15, %s1663_s13 }
  0x68   : > { %v781_v0 = vld [vmem:[%s619_s11] sm:$0xff]  ;;  %vm782_vm0 = vcmask 261120  }
  0x69   : > { %783 = vst.msk [vmem:[%s2444_s18] sm:$0xff] %vm782_vm0, %v781_v0 }
  0x6a PF: > { %vm787_vm1 = vcmask 261120   ;;  %v2097_v3 = vmov 32.0   ;;  %v1665_v15 = vld [vmem:[%s2408_s16 + $0x8] sm:$0xff]  ;;  %v1664_v16 = vld [vmem:[%s2408_s16] sm:$0xff]  ;;  %s2700_s22 = scalar_lea.vmem [#allocation5], %s2382_s14  ;;  %s2701_s11 = scalar_lea.vmem [#allocation7], %s2382_s14  ;;  %v862_v51 = vlaneseq }
  0x6b   : > { %1815 = vrcp.f32 %v2097_v3  ;;  %855 = vmatpush.bf16.msra.mxu0 %v1665_v15  ;;  %v1807_v26 = vld [vmem:[%s2700_s22] ss:$0 sm:$0xff]  ;;  %s2702_s5 = scalar_lea.vmem %s2624_s4, %s2398_s29  ;;  %s2098_s16 = smov 104   ;;  %vm874_vm6 = vcmask 64512   ;;  %v2105_v54 = vmov 0.0   ;;  %vm911_vm8 = vcmask 1043456  }
  0x6c   : > { %v1808_v29 = vld [vmem:[%s2701_s11] ss:$0 sm:$0xff]  ;;  %s2099_s1 = smov 120   ;;  %s2100_s3 = smov 96   ;;  %v863_v52 = vshrl.u32 %v862_v51, 7  ;;  %v865_v53 = vand.u32 127, %v862_v51 }
  0x6d   : > { %v1809_v33 = vld [vmem:[%s2702_s5] ss:$0 sm:$0xff]  ;;  %s2101_s25 = smov 72   ;;  %s2102_s6 = smov 88   ;;  %vm1109_vm9 = vcmask 130048   ;;  %vm1111_vm10 = vcmask 195584  }
  0x6e   : > { %s2103_s8 = smov 112   ;;  %s2104_s13 = smov 80   ;;  %vm866_vm7 = vcmp.gt.s32.totalorder %v865_v53, %v863_v52 }
  0x6f   : > { %856 = vmatpush.bf16.msra.mxu0 %v1664_v16  ;;  %v867_v55 = vsel %vm866_vm7, -1e+09, %v2105_v54  ;;  %s2106_s30 = smov 64   ;;  %s2107_s9 = smov 56  }
  0x70   : > { %v2449_v1 = vld [vmem:[%s2444_s18] sm:$0xff]  ;;  %s2108_s0 = smov 40   ;;  %s2109_s21 = smov 48  }
  0x71   : > { %v788_v2 = vsel %vm787_vm1, %v2449_v1, 0.0  ;;  %v1816_v4 = vpop.eup %1815  ;;  %s2110_s15 = smov 8   ;;  %s2111_s23 = smov 24  }
  0x72   : > { %789 = vadd.xlane.f32.xlu0 %v788_v2  ;;  %v792_v5 = vmul.f32 32.0, %v1816_v4  ;;  %vm796_vm2 = vweird.f32 %v1816_v4  ;;  %s2112_s22 = smov 16   ;;  %s2703_s17 = sld [smem:[#allocation34_spill]] }
  0x73   : > { %p1654_p9 = scmp.ge.s32.totalorder %s2079_s24, 1 }
  0x74   : > { %v793_v6 = vsub.f32 1.0, %v792_v5 }
  0x76   : > { %v794_v7 = vmul.f32 %v1816_v4, %v793_v6 }
  0x78   : > { %v795_v8 = vadd.f32 %v1816_v4, %v794_v7  ;;  %s2704_s5 = scalar_lea.vmem %s2703_s17, %s2398_s29 }
  0x7a   : > { %v2453_v9 = vsel %vm796_vm2, %v1816_v4, %v795_v8 }
  0xe5   : > { %v790_v10 = vpop.xlane.xlu0 %789 }
  0xe6   : > { %v798_v11 = vmul.f32 %v2453_v9, %v790_v10 }
  0xe8   : > { %v799_v12 = vsub.f32 %v2449_v1, %v798_v11 }
  0xea   : > { %v800_v13 = vmul.f32 %v799_v12, %v799_v12 }
  0xec   : > { %v801_v14 = vsel %vm787_vm1, %v800_v13, 0.0 }
  0xed   : > { %802 = vadd.xlane.f32.xlu0 %v801_v14 }
 0x160   : > { %v803_v17 = vpop.xlane.xlu0 %802 }
 0x161   : > { %v804_v18 = vmul.f32 %v803_v17, %v2453_v9 }
 0x163   : > { %v805_v19 = vadd.f32 1e-05, %v804_v18 }
 0x165   : > { %1817 = vrsqrt.f32 %v805_v19  ;;  %vm812_vm4 = vweird.f32 %v805_v19 }
 0x16b   : > { %v1818_v20 = vpop.eup %1817 }
 0x16c   : > { %v807_v21 = vmul.f32 %v1818_v20, %v805_v19  ;;  %vm813_vm3 = vweird.f32 %v1818_v20 }
 0x16d   : > { %vm814_vm5 = vmor %vm812_vm4, %vm813_vm3  ;;  %vm1274_vm3 = vcmask 523264  }
 0x16e   : > { %v808_v22 = vmul.f32 %v1818_v20, %v807_v21 }
 0x170   : > { %v809_v23 = vmul.f32 0.5, %v808_v22 }
 0x172   : > { %v810_v24 = vsub.f32 1.5, %v809_v23 }
 0x174   : > { %v811_v25 = vmul.f32 %v1818_v20, %v810_v24 }
 0x176   : > { %v815_v27 = vsel %vm814_vm5, %v1818_v20, %v811_v25 }
 0x177   : > { %v816_v28 = vmul.f32 %v815_v27, %v799_v12 }
 0x179   : > { %v820_v30 = vmul.f32 %v1807_v26, %v816_v28 }
 0x17b   : > { %v824_v31 = vadd.f32 %v1808_v29, %v820_v30 }
 0x17d   : > { %v825_v32 = vpack.c.bf16 %v824_v31, %v824_v31 }
 0x17f   : > { %1609 = vmatmul.msk.bf16.vlgmr.msra.gmra.mxu0 %vm787_vm1, %v825_v32 }
 0x1fc   : > { %v858_v34 = vpop.f32.mrf.mxu0 }
 0x1fd   : > { %v859_v35 = vadd.f32 %v1809_v33, %v858_v34 }
 0x1ff   : > { %v868_v36 = vpack.c.bf16 %v859_v35, %v859_v35 }
 0x201   : > { %v870_v37 = vunpack.c.l.b16 %v868_v36 }
 0x203   : > { %v2471_v38 = vpack.c.b16 %v870_v37, %v870_v37 }
 0x204   : > { %v860_v39 = vpop.f32.mrf.mxu0 }
 0x205   : > { %1040 = vrot.lane.b32.xlu0 %v2471_v38, %s2098_s16  ;;  %928 = vrot.lane.b32.xlu2 %v2471_v38, %s2099_s1 }
 0x206   : > { %872 = vrot.lane.b32.xlu1 %v2471_v38, %s2100_s3 }
 0x20d   : > { %1042 = vrot.lane.b32.xlu2 %v2471_v38, %s2101_s25 }
 0x20e   : > { %930 = vrot.lane.b32.xlu1 %v2471_v38, %s2102_s6 }
 0x215   : > { %984 = vrot.lane.b32.xlu2 %v2471_v38, %s2103_s8 }
 0x216   : > { %986 = vrot.lane.b32.xlu1 %v2471_v38, %s2104_s13 }
 0x25f   : > { %v929_v40 = vpop.permute.xlu2 %928 }
 0x267   : > { %v1043_v43 = vpop.permute.xlu2 %1042 }
 0x268   : > { %v1048_v46 = vsel %vm874_vm6, %v1043_v43, 0 }
 0x26f   : > { %v985_v49 = vpop.permute.xlu2 %984 }
 0x277   : > { %v1041_v50 = vpop.permute.xlu0 %1040 }
 0x278   : > { %v873_v41 = vpop.permute.xlu1 %872 }
 0x279   : > { %v879_v42 = vsel %vm874_vm6, %v873_v41, 0 }
 0x27a   : > { %888 = vmatpush.bf16.xpose.msra.mxu1 %v879_v42 }
 0x280   : > { %v931_v44 = vpop.permute.xlu1 %930 }
 0x281   : > { %1610 = vmatmul.msk.bf16.vlgmr.msra.gmra.mxu1 %vm874_vm6, %v868_v36  ;;  %v936_v45 = vsel %vm874_vm6, %v931_v44, 0 }
 0x282   : > { %945 = vmatpush.bf16.xpose.msra.mxu3 %v936_v45 }
 0x288   : > { %v987_v47 = vpop.permute.xlu1 %986 }
 0x289   : > { %1612 = vmatmul.msk.bf16.vlgmr.msra.gmra.mxu3 %vm874_vm6, %v929_v40  ;;  %v992_v48 = vsel %vm874_vm6, %v987_v47, 0 }
 0x28a   : > { %1057 = vmatpush.bf16.xpose.msrb.mxu3 %v1048_v46  ;;  %1001 = vmatpush.bf16.xpose.msrb.mxu0 %v992_v48 }
 0x291   : > { %1614 = vmatmul.msk.bf16.vlgmr.msrb.gmra.mxu0 %vm874_vm6, %v985_v49 }
 0x299   : > { %1616 = vmatmul.msk.bf16.vlgmr.msrb.gmra.mxu3 %vm874_vm6, %v1041_v50 }
 0x2fe   : > { %v890_v56 = vpop.f32.mrf.mxu1 }
 0x2ff   : > { %v891_v57 = vadd.f32 %v890_v56, %v867_v55 }
 0x301   : > { %v894_v58 = vsel %vm874_vm6, %v891_v57, -inf }
 0x302   : > { %895 = vmax.xlane.f32.xlu1 %v894_v58 }
 0x306   : > { %v892_v59 = vpop.f32.mrf.mxu1 }
 0x30c   : > { %v947_v60 = vpop.f32.mrf.mxu3 }
 0x30d   : > { %v948_v61 = vadd.f32 %v947_v60, %v867_v55 }
 0x30e   : > { %v1003_v62 = vpop.f32.mrf.mxu0 }
 0x30f   : > { %v951_v63 = vsel %vm874_vm6, %v948_v61, -inf  ;;  %v1004_v0 = vadd.f32 %v1003_v62, %v867_v55  ;;  %v1667_v62 = vld [vmem:[%s2413_s27 + $0x8] sm:$0xff] }
 0x310   : > { %952 = vmax.xlane.f32.xlu2 %v951_v63  ;;  %1143 = vmatpush.bf16.msra.mxu0 %v1667_v62  ;;  %v1666_v63 = vld [vmem:[%s2413_s27] sm:$0xff] }
 0x311   : > { %v1007_v4 = vsel %vm874_vm6, %v1004_v0, -inf }
 0x314   : > { %v949_v2 = vpop.f32.mrf.mxu3  ;;  %1144 = vmatpush.bf16.msra.mxu0 %v1666_v63 }
 0x316   : > { %v1005_v3 = vpop.f32.mrf.mxu0 }
 0x318   : > { %1008 = vmax.xlane.f32.xlu2 %v1007_v4 }
 0x31c   : > { %v1059_v5 = vpop.f32.mrf.mxu3 }
 0x31d   : > { %v1060_v6 = vadd.f32 %v1059_v5, %v867_v55 }
 0x31f   : > { %v1063_v7 = vsel %vm874_vm6, %v1060_v6, -inf }
 0x320   : > { %1064 = vmax.xlane.f32.xlu0 %v1063_v7 }
 0x324   : > { %v1061_v8 = vpop.f32.mrf.mxu3 }
 0x325   : > { %v1810_v8 = vld [vmem:[%s2704_s5] ss:$0 sm:$0xff] }
 0x330   : > { %906 = vrot.lane.b32.xlu2 %v2471_v38, %s2106_s30 }
 0x334   : > { %963 = vrot.lane.b32.xlu0 %v2471_v38, %s2107_s9 }
 0x338   : > { %1075 = vrot.lane.b32.xlu2 %v2471_v38, %s2108_s0 }
 0x33c   : > { %1019 = vrot.lane.b32.xlu0 %v2471_v38, %s2109_s21 }
 0x375   : > { %v896_v10 = vpop.xlane.xlu1 %895 }
 0x376   : > { %v897_v11 = vsub.f32 %v891_v57, %v896_v10 }
 0x378   : > { %v898_v12 = vmul.f32 1.442695, %v897_v11 }
 0x37a   : > { %1819 = vpow2.f32 %v898_v12 }
 0x380   : > { %v1820_v13 = vpop.eup %1819 }
 0x381   : > { %v900_v14 = vsel %vm874_vm6, %v1820_v13, 0.0 }
 0x382   : > { %901 = vadd.xlane.f32.xlu1 %v900_v14 }
 0x383   : > { %v953_v15 = vpop.xlane.xlu2 %952 }
 0x384   : > { %v954_v16 = vsub.f32 %v948_v61, %v953_v15 }
 0x386   : > { %v955_v17 = vmul.f32 1.442695, %v954_v16 }
 0x388   : > { %1821 = vpow2.f32 %v955_v17 }
 0x38b   : > { %v1009_v18 = vpop.xlane.xlu2 %1008 }
 0x38c   : > { %v1010_v25 = vsub.f32 %v1004_v0, %v1009_v18 }
 0x38e   : > { %v1822_v19 = vpop.eup %1821  ;;  %v1011_v27 = vmul.f32 1.442695, %v1010_v25 }
 0x38f   : > { %v957_v20 = vsel %vm874_vm6, %v1822_v19, 0.0 }
 0x390   : > { %958 = vadd.xlane.f32.xlu1 %v957_v20  ;;  %v1669_v20 = vld [vmem:[%s2426_s7 + $0x8] sm:$0xff] }
 0x393   : > { %v1065_v21 = vpop.xlane.xlu0 %1064  ;;  %v907_v22 = vpop.permute.xlu2 %906 }
 0x394   : > { %v1066_v23 = vsub.f32 %v1060_v6, %v1065_v21  ;;  %v913_v24 = vsel %vm911_vm8, %v907_v22, 0  ;;  %v1668_v21 = vld [vmem:[%s2426_s7] sm:$0xff]  ;;  %s2705_s7 = scalar_lea.vmem [#allocation8], %s2382_s14 }
 0x395   : > { %922 = vmatpush.bf16.msra.mxu2 %v913_v24 }
 0x396   : > { %v1067_v26 = vmul.f32 1.442695, %v1066_v23 }
 0x398   : > { %1823 = vpow2.f32 %v1067_v26 }
 0x399   : > { %1825 = vpow2.f32 %v1011_v27 }
 0x39b   : > { %v1076_v39 = vpop.permute.xlu2 %1075 }
 0x39c   : > { %v1081_v41 = vsel %vm911_vm8, %v1076_v39, 0  ;;  %v1813_v39 = vld [vmem:[%s767_s26] ss:$0 sm:$0xff] }
 0x39e   : > { %v1824_v28 = vpop.eup %1823 }
 0x39f   : > { %v1069_v29 = vsel %vm874_vm6, %v1824_v28, 0.0  ;;  %v1826_v30 = vpop.eup %1825 }
 0x3a0   : > { %1070 = vadd.xlane.f32.xlu1 %v1069_v29  ;;  %v1013_v33 = vsel %vm874_vm6, %v1826_v30, 0.0 }
 0x3a6   : > { %v964_v31 = vpop.permute.xlu0 %963 }
 0x3a7   : > { %v969_v32 = vsel %vm911_vm8, %v964_v31, 0 }
 0x3a8   : > { %978 = vmatpush.bf16.msrb.mxu2 %v969_v32  ;;  %1014 = vadd.xlane.f32.xlu1 %v1013_v33  ;;  %v1812_v33 = vld [vmem:[%s759_s2] ss:$0 sm:$0xff] }
 0x3ae   : > { %v1020_v34 = vpop.permute.xlu0 %1019 }
 0x3af   : > { %v1025_v35 = vsel %vm911_vm8, %v1020_v34, 0 }
 0x3b0   : > { %1034 = vmatpush.bf16.msrb.mxu1 %v1025_v35 }
 0x3b4   : > { %1213 = vmatpush.bf16.msra.mxu1 %v1669_v20 }
 0x3b8   : > { %1214 = vmatpush.bf16.msra.mxu1 %v1668_v21 }
 0x3f5   : > { %v902_v36 = vpop.xlane.xlu1 %901 }
 0x3f6   : > { %1827 = vrcp.f32 %v902_v36 }
 0x3fc   : > { %v1828_v37 = vpop.eup %1827 }
 0x3fd   : > { %v904_v38 = vmul.f32 %v1828_v37, %v1820_v13  ;;  %v1673_v37 = vld [vmem:[%s2440_s10 + $0x18] sm:$0xff] }
 0x3fe   : > { %1282 = vmatpush.bf16.msra.mxu3 %v1673_v37 }
 0x3ff   : > { %v905_v40 = vpack.c.bf16 %v904_v38, %v904_v38  ;;  %v1672_v38 = vld [vmem:[%s2440_s10 + $0x10] sm:$0xff] }
 0x401   : > { %1611 = vmatmul.msk.bf16.vlgmr.msra.gmra.mxu2 %vm874_vm6, %v905_v40  ;;  %v1671_v40 = vld [vmem:[%s2440_s10 + $0x8] sm:$0xff] }
 0x402   : > { %1090 = vmatpush.bf16.msra.mxu2 %v1081_v41  ;;  %1283 = vmatpush.bf16.msra.mxu3 %v1672_v38 }
 0x403   : > { %v959_v42 = vpop.xlane.xlu1 %958 }
 0x404   : > { %1829 = vrcp.f32 %v959_v42 }
 0x406   : > { %1284 = vmatpush.bf16.msra.mxu3 %v1671_v40 }
 0x40a   : > { %v1830_v43 = vpop.eup %1829 }
 0x40b   : > { %v961_v44 = vmul.f32 %v1830_v43, %v1822_v19  ;;  %v1670_v43 = vld [vmem:[%s2440_s10] sm:$0xff] }
 0x40c   : > { %1285 = vmatpush.bf16.msra.mxu3 %v1670_v43 }
 0x40d   : > { %v962_v45 = vpack.c.bf16 %v961_v44, %v961_v44 }
 0x411   : > { %1613 = vmatmul.msk.bf16.vlgmr.msrb.gmra.mxu2 %vm874_vm6, %v962_v45 }
 0x413   : > { %v1071_v46 = vpop.xlane.xlu1 %1070 }
 0x414   : > { %1831 = vrcp.f32 %v1071_v46 }
 0x41a   : > { %v1832_v47 = vpop.eup %1831 }
 0x41b   : > { %v1073_v48 = vmul.f32 %v1832_v47, %v1824_v28  ;;  %v1015_v49 = vpop.xlane.xlu1 %1014 }
 0x41c   : > { %1833 = vrcp.f32 %v1015_v49 }
 0x41d   : > { %v1074_v50 = vpack.c.bf16 %v1073_v48, %v1073_v48 }
 0x421   : > { %1617 = vmatmul.msk.bf16.vlgmr.msra.gmra.mxu2 %vm874_vm6, %v1074_v50 }
 0x422   : > { %v1834_v51 = vpop.eup %1833 }
 0x423   : > { %v1017_v52 = vmul.f32 %v1834_v51, %v1826_v30  ;;  %v1811_v30 = vld [vmem:[%s2705_s7] ss:$0 sm:$0xff] }
 0x425   : > { %v1018_v53 = vpack.c.bf16 %v1017_v52, %v1017_v52 }
 0x427   : > { %1615 = vmatmul.msk.bf16.vlgmr.msrb.gmra.mxu1 %vm874_vm6, %v1018_v53 }
 0x484   : > { %v924_v54 = vpop.f32.mrf.mxu2 }
 0x48c   : > { %v926_v55 = vpop.f32.mrf.mxu2 }
 0x494   : > { %v980_v56 = vpop.f32.mrf.mxu2 }
 0x495   : > { %1097 = vrot.lane.b32.xlu1 %v980_v56, %s2110_s15 }
 0x49c   : > { %v982_v57 = vpop.f32.mrf.mxu2 }
 0x4a4   : > { %v1036_v58 = vpop.f32.mrf.mxu1  ;;  %v1092_v59 = vpop.f32.mrf.mxu2 }
 0x4a5   : > { %1105 = vrot.lane.b32.xlu0 %v1092_v59, %s2111_s23  ;;  %1101 = vrot.lane.b32.xlu2 %v1036_v58, %s2112_s22 }
 0x4ac   : > { %v1038_v60 = vpop.f32.mrf.mxu1  ;;  %v1094_v61 = vpop.f32.mrf.mxu2 }
 0x4ad   : > { %v1814_v61 = vld [vmem:[%s775_s19] ss:$0 sm:$0xff] }
 0x4ff   : > { %v1102_v3 = vpop.permute.xlu2 %1101 }
 0x507   : > { %v1098_v0 = vpop.permute.xlu1 %1097 }
 0x508   : > { %v1108_v2 = vsel %vm874_vm6, %v924_v54, %v1098_v0 }
 0x509   : > { %v1110_v5 = vsel %vm1109_vm9, %v1108_v2, %v1102_v3 }
 0x517   : > { %v1106_v4 = vpop.permute.xlu0 %1105 }
 0x518   : > { %v1112_v6 = vsel %vm1111_vm10, %v1110_v5, %v1106_v4 }
 0x519   : > { %v1113_v7 = vpack.c.bf16 %v1112_v6, %v1112_v6 }
 0x51b   : > { %1626 = vmatmul.msk.bf16.vlgmr.msra.gmra.mxu0 %vm787_vm1, %v1113_v7 }
 0x598   : > { %v1146_v10 = vpop.f32.mrf.mxu0 }
 0x599   : > { %v1147_v11 = vadd.f32 %v1810_v8, %v1146_v10 }
 0x59b   : > { %v2518_v12 = vadd.f32 %v1147_v11, %v2449_v1 }
 0x59d   : > { %v1153_v13 = vsel %vm787_vm1, %v2518_v12, 0.0 }
 0x59e   : > { %1154 = vadd.xlane.f32.xlu2 %v1153_v13 }
 0x5a0   : > { %v1148_v14 = vpop.f32.mrf.mxu0 }
 0x611   : > { %v1155_v15 = vpop.xlane.xlu2 %1154 }
 0x612   : > { %v1156_v16 = vmul.f32 %v1155_v15, %v2453_v9 }
 0x614   : > { %v1157_v17 = vsub.f32 %v2518_v12, %v1156_v16 }
 0x616   : > { %v1158_v18 = vmul.f32 %v1157_v17, %v1157_v17 }
 0x618   : > { %v1159_v19 = vsel %vm787_vm1, %v1158_v18, 0.0 }
 0x619   : > { %1160 = vadd.xlane.f32.xlu0 %v1159_v19 }
 0x68c   : > { %v1161_v1 = vpop.xlane.xlu0 %1160 }
 0x68d   : > { %v1162_v22 = vmul.f32 %v1161_v1, %v2453_v9 }
 0x68f   : > { %v1163_v23 = vadd.f32 1e-05, %v1162_v22 }
 0x691   : > { %1835 = vrsqrt.f32 %v1163_v23  ;;  %vm1170_vm12 = vweird.f32 %v1163_v23 }
 0x697   : > { %v1836_v24 = vpop.eup %1835 }
 0x698   : > { %v1165_v25 = vmul.f32 %v1836_v24, %v1163_v23  ;;  %vm1171_vm11 = vweird.f32 %v1836_v24 }
 0x699   : > { %vm1172_vm13 = vmor %vm1170_vm12, %vm1171_vm11 }
 0x69a   : > { %v1166_v26 = vmul.f32 %v1836_v24, %v1165_v25 }
 0x69c   : > { %v1167_v27 = vmul.f32 0.5, %v1166_v26 }
 0x69e   : > { %v1168_v28 = vsub.f32 1.5, %v1167_v27 }
 0x6a0   : > { %v1169_v29 = vmul.f32 %v1836_v24, %v1168_v28 }
 0x6a2   : > { %v1173_v31 = vsel %vm1172_vm13, %v1836_v24, %v1169_v29 }
 0x6a3   : > { %v1174_v32 = vmul.f32 %v1173_v31, %v1157_v17 }
 0x6a5   : > { %v1178_v34 = vmul.f32 %v1811_v30, %v1174_v32 }
 0x6a7   : > { %v1182_v35 = vadd.f32 %v1812_v33, %v1178_v34 }
 0x6a9   : > { %v1183_v36 = vpack.c.bf16 %v1182_v35, %v1182_v35 }
 0x6ab   : > { %1635 = vmatmul.msk.bf16.vlgmr.msra.gmra.mxu1 %vm787_vm1, %v1183_v36 }
 0x728   : > { %v1216_v41 = vpop.f32.mrf.mxu1 }
 0x729   : > { %v1217_v42 = vadd.f32 %v1813_v39, %v1216_v41 }
 0x72b   : > { %v1636_v44 = vmul.f32 -1.702, %v1217_v42 }
 0x72d   : > { %v1222_v45 = vmul.f32 1.442695, %v1636_v44 }
 0x72f   : > { %1837 = vpow2.f32 %v1222_v45 }
 0x730   : > { %v1218_v46 = vpop.f32.mrf.mxu1 }
 0x735   : > { %v1838_v47 = vpop.eup %1837 }
 0x736   : > { %v1224_v48 = vadd.f32 1.0, %v1838_v47 }
 0x738   : > { %1839 = vrcp.f32 %v1224_v48  ;;  %v1236_v52 = vand.u32 2147483648, %v1224_v48  ;;  %v1234_v54 = vand.u32 2147483647, %v1224_v48  ;;  %vm1230_vm15 = vweird.f32 %v1224_v48 }
 0x73a   : > { %v1237_v56 = vor.u32 1.1754944e-38, %v1236_v52  ;;  %vm1235_vm2 = vcmp.eq.f32.partialorder %v1234_v54, 8.507059e+37 }
 0x73e   : > { %v1840_v49 = vpop.eup %1839 }
 0x73f   : > { %v1226_v50 = vmul.f32 %v1840_v49, %v1224_v48  ;;  %vm1231_vm14 = vweird.f32 %v1840_v49 }
 0x740   : > { %vm1232_vm0 = vmor %vm1230_vm15, %vm1231_vm14 }
 0x741   : > { %v1227_v51 = vsub.f32 1.0, %v1226_v50 }
 0x743   : > { %v1228_v53 = vmul.f32 %v1840_v49, %v1227_v51 }
 0x745   : > { %v1229_v55 = vadd.f32 %v1840_v49, %v1228_v53 }
 0x747   : > { %v1233_v57 = vsel %vm1232_vm0, %v1840_v49, %v1229_v55 }
 0x748   : > { %v1238_v58 = vsel %vm1235_vm2, %v1237_v56, %v1233_v57 }
 0x749   : > { %v1240_v59 = vmul.f32 %v1238_v58, %v1217_v42 }
 0x74b   : > { %v1241_v60 = vpack.c.bf16 %v1240_v59, %v1240_v59 }
 0x74d   : > { %1653 = vmatmul.msk.bf16.vlgmr.msra.gmra.mxu3 %vm1274_vm3, %v1241_v60 }
 0x7d0   : > { %v1287_v62 = vpop.f32.mrf.mxu3 }
 0x7d1   : > { %v1291_v63 = vadd.f32 %v1287_v62, %v2518_v12 }
 0x7d3   : > { %v1296_v0 = vadd.f32 %v1814_v61, %v1291_v63 }
 0x7d4   : > { %1300 = sbr.rel (%p1654_p9) target bundleno = 2010 (0x7da), region = 104 }
 0x7d8   : > { %v1289_v2 = vpop.f32.mrf.mxu3 }
 0x7d9   : > { %1301 = vst.msk [vmem:[%s2444_s18] sm:$0xff] %vm787_vm1, %v1296_v0 }
 0x7da PF: > { %p1655_p12 = scmp.ne.s32.totalorder %s2079_s24, 1 }
 0x7db   : > { %s2709_s29 = sld [smem:[#allocation41_spill]] (!%p1655_p12) }
 0x7dc   : > { %1305 = sbr.rel (%p1655_p12) target bundleno = 2286 (0x8ee), region = 108  ;;  %s2710_s13 = sld [smem:[#allocation42_spill]] (!%p1655_p12) }
 0x7e1   : > { %v1308_v3 = vsel %vm787_vm1, %v1296_v0, 0.0  ;;  %v1841_v19 = vld [vmem:[%s2709_s29] ss:$0 sm:$0xff] }
 0x7e2   : > { %1309 = vadd.xlane.f32.xlu0 %v1308_v3 }
 0x855   : > { %v1310_v4 = vpop.xlane.xlu0 %1309 }
 0x856   : > { %v1311_v5 = vmul.f32 %v1310_v4, %v2453_v9 }
 0x858   : > { %v1312_v6 = vsub.f32 %v1296_v0, %v1311_v5 }
 0x85a   : > { %v1313_v7 = vmul.f32 %v1312_v6, %v1312_v6 }
 0x85c   : > { %v1314_v8 = vsel %vm787_vm1, %v1313_v7, 0.0 }
 0x85d   : > { %1315 = vadd.xlane.f32.xlu0 %v1314_v8 }
 0x8d0   : > { %v1316_v10 = vpop.xlane.xlu0 %1315 }
 0x8d1   : > { %v1317_v11 = vmul.f32 %v1316_v10, %v2453_v9  ;;  %v1842_v9 = vld [vmem:[%s2710_s13] ss:$0 sm:$0xff] }
 0x8d3   : > { %v1318_v12 = vadd.f32 1e-05, %v1317_v11 }
 0x8d5   : > { %1843 = vrsqrt.f32 %v1318_v12  ;;  %vm1325_vm5 = vweird.f32 %v1318_v12 }
 0x8db   : > { %v1844_v13 = vpop.eup %1843 }
 0x8dc   : > { %v1320_v14 = vmul.f32 %v1844_v13, %v1318_v12  ;;  %vm1326_vm4 = vweird.f32 %v1844_v13 }
 0x8dd   : > { %vm1327_vm6 = vmor %vm1325_vm5, %vm1326_vm4 }
 0x8de   : > { %v1321_v15 = vmul.f32 %v1844_v13, %v1320_v14 }
 0x8e0   : > { %v1322_v16 = vmul.f32 0.5, %v1321_v15 }
 0x8e2   : > { %v1323_v17 = vsub.f32 1.5, %v1322_v16 }
 0x8e4   : > { %v1324_v18 = vmul.f32 %v1844_v13, %v1323_v17 }
 0x8e6   : > { %v1328_v20 = vsel %vm1327_vm6, %v1844_v13, %v1324_v18 }
 0x8e7   : > { %v1329_v21 = vmul.f32 %v1328_v20, %v1312_v6 }
 0x8e9   : > { %v1333_v1 = vmul.f32 %v1841_v19, %v1329_v21 }
 0x8eb   : > { %v1337_v22 = vadd.f32 %v1842_v9, %v1333_v1 }
 0x8ed   : > { %1338 = vst.msk [vmem:[%s2444_s18] sm:$0xff] %vm787_vm1, %v1337_v22 }
 0x8ee PF: > { %s2711_s30 = sld [smem:[#allocation20_spill]]  ;;  %s1352_s12 = sshll.u32 %s2444_s18, 4  ;;  %s1353_s12 = int_to_ptr.vmem [resolvable:$true] %s1352_s12 }
 0x8ef   : > { %s2713_s23 = sld [smem:[#allocation43_spill]]  ;;  %s1340_s5 = scalar_lea.sflag [#allocation4], %s2370_s20 }
 0x8f4   : > { %s1657_s0 = sshll.u32 %s2711_s30, 3 }
 0x8f5   : > { %s2714_s11 = smov %s2713_s23  ;;  %s1350_s22 = scalar_lea.hbm %s2713_s23, %s1657_s0 }
 0x8f6   : > { %s1354_s17 = sshll.u32 %s1350_s22, 4  ;;  %s1985_s14 = scalar_lea.hbm %s2714_s11, 16  ;;  %s1355_s17 = int_to_ptr.hbm [resolvable:$true] %s1354_s17 }
 0x8f7   : > { %s1979_s7 = sshra.s32 %s1355_s17, 4  ;;  %s1980_s7 = int_to_ptr.hbm [resolvable:$true] %s1979_s7 }
 0x8f8   : > { %s1981_s27 = scalar_lea.hbm %s1980_s7, 8  ;;  %p1986_p6 = scmp.lt.s32.totalorder %s1980_s7, %s2714_s11 }
 0x8f9   : > { %p1982_p13 = scmp.ne.s32.totalorder %s1980_s7, %s1981_s27  ;;  %p1987_p10 = scmp.lt.s32.totalorder %s1985_s14, %s1981_s27 }
 0x8fb   : > { %p1983_p4 = pnand %p1982_p13, %p2329_p0  ;;  %p1988_p1 = por %p1987_p10, %p1986_p6 }
 0x8fd   : > { %p1984_p5 = pneg %p1983_p4 }
 0x8ff   : > { %p1989_p11 = pnand %p1988_p1, %p1984_p5 }
 0x901   : > { %1992 = shalt.err (!%p1989_p11)
}
 0x902   : > { %1682 = dma.vmem_to_hbm [thread:$0]  (%p2329_p0), %s1353_s12, 128, %s1355_s17, %s1340_s5  }
 0x903 PF: > { %s2715_s20 = sld [smem:[#allocation17_spill]]  ;;  %p1702_p2 = scmp.ge.s32.totalorder %s2095_s28, 2 }
 0x905   : > { %p1698_p8 = pnand %p1702_p2, %p2336_p3 }
 0x907   : > { %p1699_p7 = pneg %p1698_p8 }
 0x909   : > { %s1366_s2 = sand.u32 1, %s2715_s20  }
 0x90a   : > { %s1367_s26 = scalar_lea.sflag [#allocation4], %s1366_s2 }
 0x90b   : > { %2050 = dma.done.wait (%p1699_p7), %s1367_s26, 128  }
 0x90c   : > { %2052 = vsyncadd (%p1699_p7), %s1367_s26, 4294967168  ;;  %s37_s28 = sadd.s32 1, %s2095_s28   ;;  %s2717_s18 = sld [smem:[#allocation15_spill]] }
 0x90d   : > { %p34_p9 = scmp.ge.s32.totalorder %s37_s28, 6   ;;  %s2718_s19 = sld [smem:[#allocation16_spill]] }
 0x90e   : > { %s2719_s20 = sld [smem:[#allocation24_spill]] }
 0x90f   : > { %s2720_s21 = sld [smem:[#allocation18_spill]] }
 0x910   : > { %s2721_s22 = sld [smem:[#allocation19_spill]] }
 0x911   : > { %s2722_s23 = sld [smem:[#allocation28_spill]]  ;;  %36 = sbr.rel (!%p34_p9) target bundleno = 29 (0x1d), region = 201 }
 0x912   : > { %s2723_s24 = sld [smem:[#allocation21_spill]] }
 0x913   : > { %s2724_s25 = sld [smem:[#allocation22_spill]] }
 0x914   : > { %s2725_s26 = sld [smem:[#allocation23_spill]] }
 0x915   : > { %s2726_s27 = sld [smem:[#allocation25_spill]] }
 0x916   :  { %1373 = vsyncpa [#allocation3], 1 }
 0x917   :  { %1375 = vsyncpa [#allocation3 + $0x1], 1 }
 0x918   :  { %1376 = vsyncpa [#allocation6], 1 }
 0x919   :  { %1378 = vsyncpa [#allocation6 + $0x1], 1 }
 0x91a   :  { %1379 = vsyncpa [#allocation9], 1 }
 0x91b   :  { %1381 = vsyncpa [#allocation9 + $0x1], 1 }
 0x91c   :  { %1382 = vsyncpa [#allocation4], 1 }
 0x91d   :  { %1384 = vsyncpa [#allocation4 + $0x1], 1 }

</bundles_post_ra>
